<compile_context>
chip_gen: v5e
topology: v5e:2x2
jax: 0.10.0
libtpu: 0.0.40
codegen_flags: <defaults>
</compile_context>

<pallas_src>
import math
import functools

import jax
import jax.numpy as jnp
from jax.experimental import pallas as pl
from jax.experimental.pallas import tpu as pltpu

# ----------------------------- config (synthetic) ------------------------------
DIM = 32            # config.dim
ALPHA = 0.2         # config.alpha  -> LocalAggregator leaky-relu slope
GLOBAL_LEAKY = 0.2  # GlobalAggregator uses a FIXED 0.2 slope in the reference module
HOP = 2             # config.hop (the fused kernel hop-chain is specialized for HOP == 2)
SAMPLE_NUM = 4      # config.sample_num
NUM_NODE = 40       # config.num_node
ACTIVATE = "relu"   # config.activate
# dropout_local / dropout_global / dropout_gcn -> identity at inference.

# Set to 2 to force the 2-way batch split (v7x, 2 TensorCores/chip); None = auto-detect.
N_TENSORCORES = None


def _num_tensorcores():
    """Best-effort TensorCore count per device; falls back to 1 (safe on v5e/v6e)."""
    if N_TENSORCORES is not None:
        return int(N_TENSORCORES)
    try:
        get_info = getattr(pltpu, "get_tpu_info", None)
        if get_info is not None:
            info = get_info()
            for name in ("num_tensorcores", "tensorcore_count",
                         "tensorcores_per_chip", "num_cores_per_chip"):
                v = getattr(info, name, None)
                if isinstance(v, int) and v > 0:
                    return v
    except Exception:
        pass
    try:
        kind = jax.devices()[0].device_kind.lower()
        if "v7" in kind or "7x" in kind:
            return 2
    except Exception:
        pass
    return 1


# ----------------------------- fused forward kernel ----------------------------------
def _session_graph_kernel(h_ref, adj_ref, a_ref, ev1k_ref, ev2k_ref, sess_ref,
                          w1s_ref, w2s_ref, w3as_ref, w3bs_ref, out_ref,
                          *, alpha, leaky, act, k1, k2):
    # h_ref    : (Bb, S, D) f32   session item embeddings
    # adj_ref  : (Bb, S, S) i32   local edge types (0..4)
    # a_ref    : (4, D)           LocalAggregator a_0..a_3
    # ev1k_ref : (K1, Bb, S, D)   1st-hop neighbor embeddings, K-major
    # ev2k_ref : (K2*K1, Bb, S, D) 2nd-hop neighbor embeddings, (k2, k1)-major
    # sess_ref : (Bb, 1, D)       masked-mean session vector
    # w*_ref   : per-hop weight stacks (leading dim = HOP)
    h = h_ref[...]
    adj = adj_ref[...]
    a = a_ref[...]
    Bb, S, D = h.shape
    N0 = Bb * S

    h_bf = h.astype(jnp.bfloat16)     # hoisted: reused by both local-agg MXU pushes

    # ---------------- LocalAggregator: all Bb sessions + all 4 edge types in one push ----
    hm = (h[:, None, :, :] * a[None, :, None, :]).reshape(Bb, 4 * S, D)
    e = jnp.einsum("bnd,bsd->bns", hm.astype(jnp.bfloat16), h_bf,
                   preferred_element_type=jnp.float32)                 # (Bb, 4S, S)
    e = jnp.where(e > 0, e, alpha * e)                                 # leaky relu

    # edge-type select on the VPU (int data never touches the MXU)
    neg = jnp.full((Bb, S, S), -9e15, jnp.float32)
    logits = jnp.where(adj == 1, e[:, 0 * S:1 * S], neg)
    logits = jnp.where(adj == 2, e[:, 1 * S:2 * S], logits)
    logits = jnp.where(adj == 3, e[:, 2 * S:3 * S], logits)
    logits = jnp.where(adj == 4, e[:, 3 * S:4 * S], logits)

    # NOTE: rows with no edges get a uniform softmax -- matches reference GCE-GNN behavior.
    logits = logits - jnp.max(logits, axis=-1, keepdims=True)
    w = jnp.exp(logits)
    att = w / jnp.sum(w, axis=-1, keepdims=True)
    h_local = jnp.einsum("bqk,bkd->bqd", att.astype(jnp.bfloat16), h_bf,
                         preferred_element_type=jnp.float32)           # (Bb, S, D)

    # ---------------- GlobalAggregator chain (hop structure for HOP == 2) ----------------
    sess = sess_ref[...]                                               # (Bb, 1, D)
    ex0 = jnp.broadcast_to(sess, (Bb, S, D)).reshape(N0, D)            # session info, lvl-0
    ev1k = ev1k_ref[...].reshape(k1, N0, D)                            # (K1, N0, D)
    ev2k = ev2k_ref[...].reshape(k2, k1 * N0, D)                       # (K2, K1*N0, D)
    ex1 = jnp.broadcast_to(ex0[None], (k1, N0, D)).reshape(k1 * N0, D)  # session info, lvl-1

    def gagg(sv, nb, ex, idx):
        # sv: (N, D), nb: (K, N, D) K-major neighbor slabs, ex: (N, D); idx = hop (static)
        w1 = w1s_ref[idx].astype(jnp.bfloat16)     # (D, D)
        w2 = w2s_ref[idx]                          # (1, D) f32: applied on the VPU
        w3a = w3as_ref[idx].astype(jnp.bfloat16)   # (D, D)  top half of w3
        w3b = w3bs_ref[idx].astype(jnp.bfloat16)   # (D, D)  bottom half of w3
        K, N, _ = nb.shape

        # attention MLP for ALL K neighbors in one (K*N, D) x (D, D) MXU push
        prod = (nb * ex[None, :, :]).reshape(K * N, D)
        ak = jnp.dot(prod.astype(jnp.bfloat16), w1, preferred_element_type=jnp.float32)
        ak = jnp.where(ak > 0, ak, leaky * ak)                         # leaky relu, slope 0.2

        # w2 projection = VPU multiply + lane reduce (no 1-lane-wide MXU output)
        logit = jnp.sum(ak * w2, axis=-1, keepdims=True).reshape(K, N, 1)

        # softmax over K via leading slabs: pure VPU, no lane concat / relayout (K <= 4)
        m = logit[0]
        for k in range(1, K):
            m = jnp.maximum(m, logit[k])
        p = jnp.exp(logit - m[None])                                   # (K, N, 1)
        s = p[0]
        for k in range(1, K):
            s = s + p[k]
        pw = p * nb
        nv = pw[0]
        for k in range(1, K):
            nv = nv + pw[k]
        nv = nv / s                                                    # (N, D)

        # [self || agg] @ w3  ==  sv @ w3_top + nv @ w3_bot  (no lane-dim concat)
        out = (jnp.dot(sv.astype(jnp.bfloat16), w3a, preferred_element_type=jnp.float32) +
               jnp.dot(nv.astype(jnp.bfloat16), w3b, preferred_element_type=jnp.float32))
        return jnp.maximum(out, 0.0) if act == "relu" else jnp.tanh(out)

    sv0 = h.reshape(N0, D)
    # n_hop = 0: agg over both levels with global_agg[0]
    v00 = gagg(sv0, ev1k, ex0, 0)                                      # (N0, D)
    # level-1 output is computed directly in K-major row order so the next hop only needs
    # a leading-dim reshape (no in-kernel transpose / strided gather).
    v01 = gagg(ev1k.reshape(k1 * N0, D), ev2k, ex1, 0)                 # (K1*N0, D)
    # n_hop = 1: final agg with global_agg[1]
    v10 = gagg(v00, v01.reshape(k1, N0, D), ex0, 1)                    # (N0, D)

    # fused residual: output = h_local + h_global (dropout is identity at inference)
    out_ref[...] = h_local + v10.reshape(Bb, S, D)


# ----------------------------- SessionGraph.forward ------------------------------
def session_graph_forward(params, inputs, adj, mask_item, item, first_adj):
    emb = params["embedding"]                  # (NUM_NODE, D)
    adj_all = params["adj_all"]                # (NUM_NODE, 2)

    B, S = inputs.shape
    D = emb.shape[1]
    K1, K2 = SAMPLE_NUM, 2
    assert HOP == 2, "fused kernel hop-chain is specialized for config.hop == 2"

    # ---- XLA-side glue: embedding gathers / sampling / masked mean (tiny, fuses) ----
    # TODO(synk): these gathers could move in-kernel (one-hot matmul against the 5 KB
    # embedding table) to shave the last few XLA ops, at the cost of bf16-rounding the raw
    # embeddings; kept in XLA to preserve exact f32 gathers.
    h = jnp.take(emb, inputs, axis=0)                                   # (B, S, D)

    mask_f = mask_item.astype(jnp.float32)
    item_emb = jnp.take(emb, item, axis=0) * mask_f[..., None]          # (B, L, D)
    # max(.,1) only guards the degenerate all-padding session (reference would produce NaN);
    # identical to the reference whenever at least one item is present.
    denom = jnp.maximum(jnp.sum(mask_f, axis=-1, keepdims=True), 1.0)
    sess = (jnp.sum(item_emb, axis=1) / denom)[:, None, :]              # (B, 1, D)

    # K-major neighbor tables: transpose the *int index* arrays (cheap) so no float
    # relayout / transpose is ever needed in or around the kernel.
    idx1 = jnp.transpose(first_adj, (2, 0, 1))                          # (K1, B, S)
    ev1k = jnp.take(emb, idx1, axis=0)                                  # (K1, B, S, D)
    idx2 = jnp.transpose(jnp.take(adj_all, idx1, axis=0), (3, 0, 1, 2))  # (K2, K1, B, S)
    ev2k = jnp.take(emb, idx2, axis=0).reshape(K2 * K1, B, S, D)        # (K2*K1, B, S, D)

    # pre-stacked per-hop weights (built once in init_params)
    w1s, w2s, w3as, w3bs = params["w1s"], params["w2s_t"], params["w3as"], params["w3bs"]

    # 2-way "parallel" batch split only where there are 2 TensorCores (v7x); on v5e/v6e the
    # grid is a serial loop and a split would just double the ~600-cycle per-step overhead.
    n_split = 2 if (_num_tensorcores() >= 2 and B % 2 == 0) else 1
    Bb = B // n_split

    adj_i32 = adj.astype(jnp.int32)
    operands = (h, adj_i32, params["a_local"], ev1k, ev2k, sess, w1s, w2s, w3as, w3bs)

    # advisory cost estimate: lets XLA schedule the surrounding gather glue sensibly
    n_lvl0 = B * S
    n_lvl1 = K1 * n_lvl0
    flops = (
        B * (2 * (4 * S) * S * D + 2 * S * S * D)            # local agg: e + att @ h
        + 2 * (K1 * n_lvl0) * D * D + 4 * n_lvl0 * D * D     # agg(n_hop=0, hop=0)
        + 2 * (K2 * n_lvl1) * D * D + 4 * n_lvl1 * D * D     # agg(n_hop=0, hop=1)
        + 2 * (K1 * n_lvl0) * D * D + 4 * n_lvl0 * D * D     # agg(n_hop=1, hop=0)
    )
    transc = B * S * S + (K1 * n_lvl0 + K2 * n_lvl1 + K1 * n_lvl0)
    bytes_accessed = sum(int(x.size) * x.dtype.itemsize for x in operands) + B * S * D * 4

    kernel = functools.partial(_session_graph_kernel, alpha=ALPHA, leaky=GLOBAL_LEAKY,
                               act=ACTIVATE, k1=K1, k2=K2)
    # TODO(synk): lane-dense (packed) output layout for D=32 skipped; output is tiny here
    # and downstream (compute_scores) is out of scope for forward().
    out = pl.pallas_call(
        kernel,
        out_shape=jax.ShapeDtypeStruct((B, S, D), jnp.float32),
        grid=(n_split,),
        in_specs=[
            pl.BlockSpec((Bb, S, D), lambda i: (i, 0, 0)),              # h
            pl.BlockSpec((Bb, S, S), lambda i: (i, 0, 0)),              # adj
            pl.BlockSpec((4, D), lambda i: (0, 0)),                     # a_local
            pl.BlockSpec((K1, Bb, S, D), lambda i: (0, i, 0, 0)),       # 1st-hop, K-major
            pl.BlockSpec((K2 * K1, Bb, S, D), lambda i: (0, i, 0, 0)),  # 2nd-hop, K-major
            pl.BlockSpec((Bb, 1, D), lambda i: (i, 0, 0)),              # session vector
            pl.BlockSpec((HOP, D, D), lambda i: (0, 0, 0)),             # w1 stack
            pl.BlockSpec((HOP, 1, D), lambda i: (0, 0, 0)),             # w2 stack (transposed)
            pl.BlockSpec((HOP, D, D), lambda i: (0, 0, 0)),             # w3 top halves
            pl.BlockSpec((HOP, D, D), lambda i: (0, 0, 0)),             # w3 bottom halves
        ],
        out_specs=pl.BlockSpec((Bb, S, D), lambda i: (i, 0, 0)),
        compiler_params=pltpu.CompilerParams(dimension_semantics=("parallel",)),
        cost_estimate=pl.CostEstimate(flops=int(flops), transcendentals=int(transc),
                                      bytes_accessed=int(bytes_accessed)),
    )(*operands)
    return out


# ----------------------------- parameter init ------------------------------------
def init_params(key):
    stdv = 1.0 / math.sqrt(DIM)
    ks = jax.random.split(key, 4 + 3 * HOP)

    def u(k, shape):
        return jax.random.uniform(k, shape, jnp.float32, -stdv, stdv)

    params = {
        "embedding": u(ks[0], (NUM_NODE, DIM)),          # nn.Embedding(num_node, dim)
        "a_local": u(ks[1], (4, DIM)),                   # LocalAggregator a_0..a_3 (dim,1) stacked
        "global_agg": [],
        # adj_all: 2 sampled global neighbors per node (matches neighbor_num[1] = 2)
        "adj_all": jax.random.randint(ks[2], (NUM_NODE, 2), 1, NUM_NODE, dtype=jnp.int32),
    }
    for i in range(HOP):
        k1, k2, k3 = ks[3 + 3 * i], ks[4 + 3 * i], ks[5 + 3 * i]
        params["global_agg"].append(
            (u(k1, (DIM, DIM)),        # GlobalAggregator.w_1
             u(k2, (DIM, 1)),          # GlobalAggregator.w_2
             u(k3, (2 * DIM, DIM)))    # GlobalAggregator.w_3
        )
    # prepacked per-hop weight stacks used by the fused kernel (built once, not per call)
    params["w1s"] = jnp.stack([w1 for (w1, _, _) in params["global_agg"]])
    params["w2s_t"] = jnp.stack([w2.reshape(1, DIM) for (_, w2, _) in params["global_agg"]])
    params["w3as"] = jnp.stack([w3[:DIM] for (_, _, w3) in params["global_agg"]])
    params["w3bs"] = jnp.stack([w3[DIM:] for (_, _, w3) in params["global_agg"]])
    # TODO(synk): w_s/w_g/w_x/w_1/w_2/glu1/glu2/linear_transform/pos_embedding belong to
    # compute_scores, which is not part of forward(); omitted here.
    return params


# ----------------------------- pure-JAX f32 reference -----------------------------
def _reference_forward(params, inputs, adj, mask_item, item, first_adj):
    emb = params["embedding"]
    adj_all = params["adj_all"]
    B, S = inputs.shape
    D = emb.shape[1]

    def local_agg(h, adj_, a):
        e = jnp.einsum("bid,bjd,kd->kbij", h, h, a)
        e = jnp.where(e > 0, e, ALPHA * e)
        neg = jnp.full((B, S, S), -9e15, jnp.float32)
        logits = jnp.where(adj_ == 1, e[0], neg)
        logits = jnp.where(adj_ == 2, e[1], logits)
        logits = jnp.where(adj_ == 3, e[2], logits)
        logits = jnp.where(adj_ == 4, e[3], logits)
        att = jax.nn.softmax(logits, axis=-1)
        return jnp.einsum("bij,bjd->bid", att, h)

    def global_agg(sv, nb, ex, w1, w2, w3):
        ak = jnp.einsum("bmkd,de->bmke", nb * ex[:, :, None, :], w1)
        ak = jnp.where(ak > 0, ak, GLOBAL_LEAKY * ak)
        logit = jnp.einsum("bmke,e->bmk", ak, w2[:, 0])
        p = jax.nn.softmax(logit, axis=-1)[..., None]
        nv = jnp.sum(p * nb, axis=2)
        out = jnp.concatenate([sv, nv], axis=-1) @ w3
        return jnp.maximum(out, 0.0) if ACTIVATE == "relu" else jnp.tanh(out)

    h = jnp.take(emb, inputs, axis=0)
    h_local = local_agg(h, adj, params["a_local"])
    mask_f = mask_item.astype(jnp.float32)
    item_emb = jnp.take(emb, item, axis=0) * mask_f[..., None]
    denom = jnp.maximum(jnp.sum(mask_f, axis=-1, keepdims=True), 1.0)
    sess = (jnp.sum(item_emb, axis=1) / denom)[:, None, :]

    neighbor_num = [SAMPLE_NUM, 2]
    support = S * neighbor_num[0]
    item_neighbors = [inputs, first_adj.reshape(B, support)]
    for i in range(1, HOP):
        sampled = jnp.take(adj_all, item_neighbors[-1].reshape(-1), axis=0)
        support *= neighbor_num[i]
        item_neighbors.append(sampled.reshape(B, support))
    entity_vectors = [jnp.take(emb, n, axis=0) for n in item_neighbors]
    session_info = [jnp.broadcast_to(sess, (B, ev.shape[1], D)) for ev in entity_vectors[:HOP]]

    for n_hop in range(HOP):
        w1, w2, w3 = params["global_agg"][n_hop]
        nxt = []
        for hop in range(HOP - n_hop):
            K = neighbor_num[hop]
            sv = entity_vectors[hop]
            nb = entity_vectors[hop + 1].reshape(B, -1, K, D)
            ex = session_info[hop]
            nxt.append(global_agg(sv, nb, ex, w1, w2, w3))
        entity_vectors = nxt
    h_global = entity_vectors[0].reshape(B, S, D)
    return h_local + h_global


# ----------------------------- main -----------------------------------------------
if __name__ == "__main__":
    key = jax.random.PRNGKey(0)
    kp, ka, kb, kc, kd = jax.random.split(key, 5)

    params = init_params(kp)

    B, S, L = 2, 8, 10
    inputs = jax.random.randint(ka, (B, S), 1, NUM_NODE, dtype=jnp.int32)
    adj = jax.random.randint(kb, (B, S, S), 0, 5, dtype=jnp.int32)
    item = jax.random.randint(kc, (B, L), 1, NUM_NODE, dtype=jnp.int32)
    mask_item = (jnp.arange(L)[None, :] < jnp.array([7, 10])[:, None]).astype(jnp.int32)
    first_adj = jax.random.randint(kd, (B, S, SAMPLE_NUM), 1, NUM_NODE, dtype=jnp.int32)

    fwd = jax.jit(session_graph_forward)
    out = jax.block_until_ready(fwd(params, inputs, adj, mask_item, item, first_adj))

    assert out.shape == (B, S, DIM), out.shape
    assert jnp.all(jnp.isfinite(out))

    # parity vs. an f32 pure-JAX reference (bf16 MXU operands -> ~1e-2-level differences)
    ref = jax.block_until_ready(
        jax.jit(_reference_forward)(params, inputs, adj, mask_item, item, first_adj))
    err = float(jnp.max(jnp.abs(out - ref)))
    assert err < 5e-2, f"max abs err vs f32 reference: {err}"

    print("KERNEL_OK")
</pallas_src>

<mosaic_0001>
module attributes {stable_mosaic.version = 11 : i64} {
  func.func @_session_graph_kernel(%arg0: i32, %arg1: memref<2x8x32xf32, #tpu.memory_space<vmem>>, %arg2: memref<2x8x8xi32, #tpu.memory_space<vmem>>, %arg3: memref<4x32xf32, #tpu.memory_space<vmem>>, %arg4: memref<4x2x8x32xf32, #tpu.memory_space<vmem>>, %arg5: memref<8x2x8x32xf32, #tpu.memory_space<vmem>>, %arg6: memref<2x1x32xf32, #tpu.memory_space<vmem>>, %arg7: memref<2x32x32xf32, #tpu.memory_space<vmem>>, %arg8: memref<2x1x32xf32, #tpu.memory_space<vmem>>, %arg9: memref<2x32x32xf32, #tpu.memory_space<vmem>>, %arg10: memref<2x32x32xf32, #tpu.memory_space<vmem>>, %arg11: memref<2x8x32xf32, #tpu.memory_space<vmem>>) attributes {dimension_semantics = [#tpu.dimension_semantics<parallel>], iteration_bounds = array<i64: 1>, scalar_prefetch = 0 : i64, scratch_operands = 0 : i64, tpu.core_type = #tpu.core_type<tc>, window_params = [{transform_indices = @transform_0, window_bounds = array<i64: 2, 8, 32>}, {transform_indices = @transform_1, window_bounds = array<i64: 2, 8, 8>}, {pipeline_mode = #tpu.pipeline_mode<synchronous>, transform_indices = @transform_2, window_bounds = array<i64: 4, 32>}, {transform_indices = @transform_3, window_bounds = array<i64: 4, 2, 8, 32>}, {transform_indices = @transform_4, window_bounds = array<i64: 8, 2, 8, 32>}, {transform_indices = @transform_5, window_bounds = array<i64: 2, 1, 32>}, {pipeline_mode = #tpu.pipeline_mode<synchronous>, transform_indices = @transform_6, window_bounds = array<i64: 2, 32, 32>}, {pipeline_mode = #tpu.pipeline_mode<synchronous>, transform_indices = @transform_7, window_bounds = array<i64: 2, 1, 32>}, {pipeline_mode = #tpu.pipeline_mode<synchronous>, transform_indices = @transform_8, window_bounds = array<i64: 2, 32, 32>}, {pipeline_mode = #tpu.pipeline_mode<synchronous>, transform_indices = @transform_9, window_bounds = array<i64: 2, 32, 32>}, {transform_indices = @transform_10, window_bounds = array<i64: 2, 8, 32>}]} {
    %c0 = arith.constant 0 : index
    %c0_0 = arith.constant 0 : index
    %c0_1 = arith.constant 0 : index
    %0 = vector.load %arg1[%c0, %c0_0, %c0_1] : memref<2x8x32xf32, #tpu.memory_space<vmem>>, vector<2x8x32xf32>
    %c0_2 = arith.constant 0 : index
    %c0_3 = arith.constant 0 : index
    %c0_4 = arith.constant 0 : index
    %1 = vector.load %arg2[%c0_2, %c0_3, %c0_4] : memref<2x8x8xi32, #tpu.memory_space<vmem>>, vector<2x8x8xi32>
    %c0_5 = arith.constant 0 : index
    %c0_6 = arith.constant 0 : index
    %2 = vector.load %arg3[%c0_5, %c0_6] : memref<4x32xf32, #tpu.memory_space<vmem>>, vector<4x32xf32>
    %3 = arith.truncf %0 : vector<2x8x32xf32> to vector<2x8x32xbf16>
    %4 = vector.shape_cast %0 : vector<2x8x32xf32> to vector<2x1x8x32xf32>
    %5 = vector.shape_cast %2 : vector<4x32xf32> to vector<1x4x1x32xf32>
    %6 = vector.broadcast %4 : vector<2x1x8x32xf32> to vector<2x4x8x32xf32>
    %7 = vector.broadcast %5 : vector<1x4x1x32xf32> to vector<2x4x8x32xf32>
    %8 = arith.mulf %6, %7 : vector<2x4x8x32xf32>
    %9 = vector.shape_cast %8 : vector<2x4x8x32xf32> to vector<2x32x32xf32>
    %10 = arith.truncf %9 : vector<2x32x32xf32> to vector<2x32x32xbf16>
    "tpu.trace_start"() <{level = 10 : i32, message = "bnd,bsd->bns"}> : () -> ()
    %cst = arith.constant dense<0.000000e+00> : vector<2x32x8xf32>
    %11 = tpu.matmul %10, %3, %cst {dimension_numbers = #tpu.dot_dimension_numbers<[2], [2], [1], [1], [0, 0, 0, 1, 1, 1], [0], [0]>} : vector<2x32x32xbf16>, vector<2x8x32xbf16>, vector<2x32x8xf32> -> vector<2x32x8xf32>
    %cst_7 = arith.constant 0.000000e+00 : f32
    "tpu.trace_stop"() : () -> ()
    %12 = vector.broadcast %cst_7 : f32 to vector<2x32x8xf32>
    %13 = arith.cmpf ogt, %11, %12 : vector<2x32x8xf32>
    %cst_8 = arith.constant 2.000000e-01 : f32
    %14 = vector.broadcast %cst_8 : f32 to vector<2x32x8xf32>
    %15 = arith.mulf %14, %11 : vector<2x32x8xf32>
    %16 = arith.select %13, %11, %15 : vector<2x32x8xi1>, vector<2x32x8xf32>
    %cst_9 = arith.constant -9.000000e+15 : f32
    %17 = vector.broadcast %cst_9 : f32 to vector<2x8x8xf32>
    %c1_i32 = arith.constant 1 : i32
    %18 = vector.broadcast %c1_i32 : i32 to vector<2x8x8xi32>
    %19 = arith.cmpi eq, %1, %18 : vector<2x8x8xi32>
    %20 = vector.extract_strided_slice %16 {offsets = [0, 0, 0], sizes = [2, 8, 8], strides = [1, 1, 1]} : vector<2x32x8xf32> to vector<2x8x8xf32>
    %21 = arith.select %19, %20, %17 : vector<2x8x8xi1>, vector<2x8x8xf32>
    %c2_i32 = arith.constant 2 : i32
    %22 = vector.broadcast %c2_i32 : i32 to vector<2x8x8xi32>
    %23 = arith.cmpi eq, %1, %22 : vector<2x8x8xi32>
    %24 = vector.extract_strided_slice %16 {offsets = [0, 8, 0], sizes = [2, 8, 8], strides = [1, 1, 1]} : vector<2x32x8xf32> to vector<2x8x8xf32>
    %25 = arith.select %23, %24, %21 : vector<2x8x8xi1>, vector<2x8x8xf32>
    %c3_i32 = arith.constant 3 : i32
    %26 = vector.broadcast %c3_i32 : i32 to vector<2x8x8xi32>
    %27 = arith.cmpi eq, %1, %26 : vector<2x8x8xi32>
    %28 = vector.extract_strided_slice %16 {offsets = [0, 16, 0], sizes = [2, 8, 8], strides = [1, 1, 1]} : vector<2x32x8xf32> to vector<2x8x8xf32>
    %29 = arith.select %27, %28, %25 : vector<2x8x8xi1>, vector<2x8x8xf32>
    %c4_i32 = arith.constant 4 : i32
    %30 = vector.broadcast %c4_i32 : i32 to vector<2x8x8xi32>
    %31 = arith.cmpi eq, %1, %30 : vector<2x8x8xi32>
    %32 = vector.extract_strided_slice %16 {offsets = [0, 24, 0], sizes = [2, 8, 8], strides = [1, 1, 1]} : vector<2x32x8xf32> to vector<2x8x8xf32>
    %33 = arith.select %31, %32, %29 : vector<2x8x8xi1>, vector<2x8x8xf32>
    %cst_10 = arith.constant dense<0xFF800000> : vector<2x8xf32>
    %34 = vector.multi_reduction <maximumf>, %33, %cst_10 [2] : vector<2x8x8xf32> to vector<2x8xf32>
    %35 = vector.shape_cast %34 : vector<2x8xf32> to vector<2x8x1xf32>
    %36 = vector.broadcast %35 : vector<2x8x1xf32> to vector<2x8x8xf32>
    %37 = arith.subf %33, %36 : vector<2x8x8xf32>
    %38 = math.exp %37 : vector<2x8x8xf32>
    %cst_11 = arith.constant dense<0.000000e+00> : vector<2x8xf32>
    %39 = vector.multi_reduction <add>, %38, %cst_11 [2] : vector<2x8x8xf32> to vector<2x8xf32>
    %40 = vector.shape_cast %39 : vector<2x8xf32> to vector<2x8x1xf32>
    %41 = vector.broadcast %40 : vector<2x8x1xf32> to vector<2x8x8xf32>
    %42 = arith.divf %38, %41 : vector<2x8x8xf32>
    %43 = arith.truncf %42 : vector<2x8x8xf32> to vector<2x8x8xbf16>
    "tpu.trace_start"() <{level = 10 : i32, message = "bqk,bkd->bqd"}> : () -> ()
    %cst_12 = arith.constant dense<0.000000e+00> : vector<2x8x32xf32>
    %44 = tpu.matmul %43, %3, %cst_12 {dimension_numbers = #tpu.dot_dimension_numbers<[2], [1], [1], [2], [0, 0, 0, 1, 1, 2], [0], [0]>} : vector<2x8x8xbf16>, vector<2x8x32xbf16>, vector<2x8x32xf32> -> vector<2x8x32xf32>
    "tpu.trace_stop"() : () -> ()
    %c0_13 = arith.constant 0 : index
    %c0_14 = arith.constant 0 : index
    %c0_15 = arith.constant 0 : index
    %45 = vector.load %arg6[%c0_13, %c0_14, %c0_15] : memref<2x1x32xf32, #tpu.memory_space<vmem>>, vector<2x1x32xf32>
    %46 = vector.shape_cast %45 : vector<2x1x32xf32> to vector<2x1x32xf32>
    %47 = vector.broadcast %46 : vector<2x1x32xf32> to vector<2x8x32xf32>
    %48 = vector.shape_cast %47 : vector<2x8x32xf32> to vector<16x32xf32>
    %c0_16 = arith.constant 0 : index
    %c0_17 = arith.constant 0 : index
    %c0_18 = arith.constant 0 : index
    %c0_19 = arith.constant 0 : index
    %49 = vector.load %arg4[%c0_16, %c0_17, %c0_18, %c0_19] : memref<4x2x8x32xf32, #tpu.memory_space<vmem>>, vector<4x2x8x32xf32>
    %50 = vector.shape_cast %49 : vector<4x2x8x32xf32> to vector<4x16x32xf32>
    %c0_20 = arith.constant 0 : index
    %c0_21 = arith.constant 0 : index
    %c0_22 = arith.constant 0 : index
    %c0_23 = arith.constant 0 : index
    %51 = vector.load %arg5[%c0_20, %c0_21, %c0_22, %c0_23] : memref<8x2x8x32xf32, #tpu.memory_space<vmem>>, vector<8x2x8x32xf32>
    %52 = vector.shape_cast %51 : vector<8x2x8x32xf32> to vector<2x64x32xf32>
    %53 = vector.shape_cast %48 : vector<16x32xf32> to vector<1x16x32xf32>
    %54 = vector.shape_cast %53 : vector<1x16x32xf32> to vector<1x16x32xf32>
    %55 = vector.broadcast %54 : vector<1x16x32xf32> to vector<4x16x32xf32>
    %56 = vector.shape_cast %55 : vector<4x16x32xf32> to vector<64x32xf32>
    %57 = vector.shape_cast %0 : vector<2x8x32xf32> to vector<16x32xf32>
    %c0_24 = arith.constant 0 : index
    %c0_25 = arith.constant 0 : index
    %c0_26 = arith.constant 0 : index
    %58 = vector.load %arg7[%c0_24, %c0_25, %c0_26] : memref<2x32x32xf32, #tpu.memory_space<vmem>>, vector<1x32x32xf32>
    %59 = vector.shape_cast %58 : vector<1x32x32xf32> to vector<32x32xf32>
    %60 = arith.truncf %59 : vector<32x32xf32> to vector<32x32xbf16>
    %c0_27 = arith.constant 0 : index
    %c0_28 = arith.constant 0 : index
    %c0_29 = arith.constant 0 : index
    %61 = vector.load %arg8[%c0_27, %c0_28, %c0_29] : memref<2x1x32xf32, #tpu.memory_space<vmem>>, vector<1x1x32xf32>
    %62 = vector.shape_cast %61 : vector<1x1x32xf32> to vector<1x32xf32>
    %c0_30 = arith.constant 0 : index
    %c0_31 = arith.constant 0 : index
    %c0_32 = arith.constant 0 : index
    %63 = vector.load %arg9[%c0_30, %c0_31, %c0_32] : memref<2x32x32xf32, #tpu.memory_space<vmem>>, vector<1x32x32xf32>
    %64 = vector.shape_cast %63 : vector<1x32x32xf32> to vector<32x32xf32>
    %65 = arith.truncf %64 : vector<32x32xf32> to vector<32x32xbf16>
    %c0_33 = arith.constant 0 : index
    %c0_34 = arith.constant 0 : index
    %c0_35 = arith.constant 0 : index
    %66 = vector.load %arg10[%c0_33, %c0_34, %c0_35] : memref<2x32x32xf32, #tpu.memory_space<vmem>>, vector<1x32x32xf32>
    %67 = vector.shape_cast %66 : vector<1x32x32xf32> to vector<32x32xf32>
    %68 = arith.truncf %67 : vector<32x32xf32> to vector<32x32xbf16>
    %69 = vector.shape_cast %48 : vector<16x32xf32> to vector<1x16x32xf32>
    %70 = vector.broadcast %69 : vector<1x16x32xf32> to vector<4x16x32xf32>
    %71 = arith.mulf %50, %70 : vector<4x16x32xf32>
    %72 = vector.shape_cast %71 : vector<4x16x32xf32> to vector<64x32xf32>
    %73 = arith.truncf %72 : vector<64x32xf32> to vector<64x32xbf16>
    %cst_36 = arith.constant dense<0.000000e+00> : vector<64x32xf32>
    %74 = tpu.matmul %73, %60, %cst_36 {dimension_numbers = #tpu.dot_dimension_numbers<[1], [0], [0], [1], [0, 0, 1, 1], [], []>} : vector<64x32xbf16>, vector<32x32xbf16>, vector<64x32xf32> -> vector<64x32xf32>
    %cst_37 = arith.constant 0.000000e+00 : f32
    %75 = vector.broadcast %cst_37 : f32 to vector<64x32xf32>
    %76 = arith.cmpf ogt, %74, %75 : vector<64x32xf32>
    %cst_38 = arith.constant 2.000000e-01 : f32
    %77 = vector.broadcast %cst_38 : f32 to vector<64x32xf32>
    %78 = arith.mulf %77, %74 : vector<64x32xf32>
    %79 = arith.select %76, %74, %78 : vector<64x32xi1>, vector<64x32xf32>
    %80 = vector.broadcast %62 : vector<1x32xf32> to vector<64x32xf32>
    %81 = arith.mulf %79, %80 : vector<64x32xf32>
    %cst_39 = arith.constant dense<0.000000e+00> : vector<64xf32>
    %82 = vector.multi_reduction <add>, %81, %cst_39 [1] : vector<64x32xf32> to vector<64xf32>
    %83 = vector.shape_cast %82 : vector<64xf32> to vector<64x1xf32>
    %84 = vector.shape_cast %83 : vector<64x1xf32> to vector<4x16x1xf32>
    %85 = vector.extract_strided_slice %84 {offsets = [0, 0, 0], sizes = [1, 16, 1], strides = [1, 1, 1]} : vector<4x16x1xf32> to vector<1x16x1xf32>
    %86 = vector.shape_cast %85 : vector<1x16x1xf32> to vector<16x1xf32>
    %87 = vector.extract_strided_slice %84 {offsets = [1, 0, 0], sizes = [1, 16, 1], strides = [1, 1, 1]} : vector<4x16x1xf32> to vector<1x16x1xf32>
    %88 = vector.shape_cast %87 : vector<1x16x1xf32> to vector<16x1xf32>
    %89 = arith.maximumf %86, %88 : vector<16x1xf32>
    %90 = vector.extract_strided_slice %84 {offsets = [2, 0, 0], sizes = [1, 16, 1], strides = [1, 1, 1]} : vector<4x16x1xf32> to vector<1x16x1xf32>
    %91 = vector.shape_cast %90 : vector<1x16x1xf32> to vector<16x1xf32>
    %92 = arith.maximumf %89, %91 : vector<16x1xf32>
    %93 = vector.extract_strided_slice %84 {offsets = [3, 0, 0], sizes = [1, 16, 1], strides = [1, 1, 1]} : vector<4x16x1xf32> to vector<1x16x1xf32>
    %94 = vector.shape_cast %93 : vector<1x16x1xf32> to vector<16x1xf32>
    %95 = arith.maximumf %92, %94 : vector<16x1xf32>
    %96 = vector.shape_cast %95 : vector<16x1xf32> to vector<1x16x1xf32>
    %97 = vector.broadcast %96 : vector<1x16x1xf32> to vector<4x16x1xf32>
    %98 = arith.subf %84, %97 : vector<4x16x1xf32>
    %99 = math.exp %98 : vector<4x16x1xf32>
    %100 = vector.extract_strided_slice %99 {offsets = [0, 0, 0], sizes = [1, 16, 1], strides = [1, 1, 1]} : vector<4x16x1xf32> to vector<1x16x1xf32>
    %101 = vector.shape_cast %100 : vector<1x16x1xf32> to vector<16x1xf32>
    %102 = vector.extract_strided_slice %99 {offsets = [1, 0, 0], sizes = [1, 16, 1], strides = [1, 1, 1]} : vector<4x16x1xf32> to vector<1x16x1xf32>
    %103 = vector.shape_cast %102 : vector<1x16x1xf32> to vector<16x1xf32>
    %104 = arith.addf %101, %103 : vector<16x1xf32>
    %105 = vector.extract_strided_slice %99 {offsets = [2, 0, 0], sizes = [1, 16, 1], strides = [1, 1, 1]} : vector<4x16x1xf32> to vector<1x16x1xf32>
    %106 = vector.shape_cast %105 : vector<1x16x1xf32> to vector<16x1xf32>
    %107 = arith.addf %104, %106 : vector<16x1xf32>
    %108 = vector.extract_strided_slice %99 {offsets = [3, 0, 0], sizes = [1, 16, 1], strides = [1, 1, 1]} : vector<4x16x1xf32> to vector<1x16x1xf32>
    %109 = vector.shape_cast %108 : vector<1x16x1xf32> to vector<16x1xf32>
    %110 = arith.addf %107, %109 : vector<16x1xf32>
    %111 = vector.broadcast %99 : vector<4x16x1xf32> to vector<4x16x32xf32>
    %112 = arith.mulf %111, %50 : vector<4x16x32xf32>
    %113 = vector.extract_strided_slice %112 {offsets = [0, 0, 0], sizes = [1, 16, 32], strides = [1, 1, 1]} : vector<4x16x32xf32> to vector<1x16x32xf32>
    %114 = vector.shape_cast %113 : vector<1x16x32xf32> to vector<16x32xf32>
    %115 = vector.extract_strided_slice %112 {offsets = [1, 0, 0], sizes = [1, 16, 32], strides = [1, 1, 1]} : vector<4x16x32xf32> to vector<1x16x32xf32>
    %116 = vector.shape_cast %115 : vector<1x16x32xf32> to vector<16x32xf32>
    %117 = arith.addf %114, %116 : vector<16x32xf32>
    %118 = vector.extract_strided_slice %112 {offsets = [2, 0, 0], sizes = [1, 16, 32], strides = [1, 1, 1]} : vector<4x16x32xf32> to vector<1x16x32xf32>
    %119 = vector.shape_cast %118 : vector<1x16x32xf32> to vector<16x32xf32>
    %120 = arith.addf %117, %119 : vector<16x32xf32>
    %121 = vector.extract_strided_slice %112 {offsets = [3, 0, 0], sizes = [1, 16, 32], strides = [1, 1, 1]} : vector<4x16x32xf32> to vector<1x16x32xf32>
    %122 = vector.shape_cast %121 : vector<1x16x32xf32> to vector<16x32xf32>
    %123 = arith.addf %120, %122 : vector<16x32xf32>
    %124 = vector.broadcast %110 : vector<16x1xf32> to vector<16x32xf32>
    %125 = arith.divf %123, %124 : vector<16x32xf32>
    %126 = arith.truncf %57 : vector<16x32xf32> to vector<16x32xbf16>
    %cst_40 = arith.constant dense<0.000000e+00> : vector<16x32xf32>
    %127 = tpu.matmul %126, %65, %cst_40 {dimension_numbers = #tpu.dot_dimension_numbers<[1], [0], [0], [1], [0, 0, 1, 1], [], []>} : vector<16x32xbf16>, vector<32x32xbf16>, vector<16x32xf32> -> vector<16x32xf32>
    %128 = arith.truncf %125 : vector<16x32xf32> to vector<16x32xbf16>
    %cst_41 = arith.constant dense<0.000000e+00> : vector<16x32xf32>
    %129 = tpu.matmul %128, %68, %cst_41 {dimension_numbers = #tpu.dot_dimension_numbers<[1], [0], [0], [1], [0, 0, 1, 1], [], []>} : vector<16x32xbf16>, vector<32x32xbf16>, vector<16x32xf32> -> vector<16x32xf32>
    %130 = arith.addf %127, %129 : vector<16x32xf32>
    %cst_42 = arith.constant 0.000000e+00 : f32
    %131 = vector.broadcast %cst_42 : f32 to vector<16x32xf32>
    %132 = arith.maximumf %130, %131 : vector<16x32xf32>
    %133 = vector.shape_cast %50 : vector<4x16x32xf32> to vector<64x32xf32>
    %c0_43 = arith.constant 0 : index
    %c0_44 = arith.constant 0 : index
    %c0_45 = arith.constant 0 : index
    %134 = vector.load %arg7[%c0_43, %c0_44, %c0_45] : memref<2x32x32xf32, #tpu.memory_space<vmem>>, vector<1x32x32xf32>
    %135 = vector.shape_cast %134 : vector<1x32x32xf32> to vector<32x32xf32>
    %136 = arith.truncf %135 : vector<32x32xf32> to vector<32x32xbf16>
    %c0_46 = arith.constant 0 : index
    %c0_47 = arith.constant 0 : index
    %c0_48 = arith.constant 0 : index
    %137 = vector.load %arg8[%c0_46, %c0_47, %c0_48] : memref<2x1x32xf32, #tpu.memory_space<vmem>>, vector<1x1x32xf32>
    %138 = vector.shape_cast %137 : vector<1x1x32xf32> to vector<1x32xf32>
    %c0_49 = arith.constant 0 : index
    %c0_50 = arith.constant 0 : index
    %c0_51 = arith.constant 0 : index
    %139 = vector.load %arg9[%c0_49, %c0_50, %c0_51] : memref<2x32x32xf32, #tpu.memory_space<vmem>>, vector<1x32x32xf32>
    %140 = vector.shape_cast %139 : vector<1x32x32xf32> to vector<32x32xf32>
    %141 = arith.truncf %140 : vector<32x32xf32> to vector<32x32xbf16>
    %c0_52 = arith.constant 0 : index
    %c0_53 = arith.constant 0 : index
    %c0_54 = arith.constant 0 : index
    %142 = vector.load %arg10[%c0_52, %c0_53, %c0_54] : memref<2x32x32xf32, #tpu.memory_space<vmem>>, vector<1x32x32xf32>
    %143 = vector.shape_cast %142 : vector<1x32x32xf32> to vector<32x32xf32>
    %144 = arith.truncf %143 : vector<32x32xf32> to vector<32x32xbf16>
    %145 = vector.shape_cast %56 : vector<64x32xf32> to vector<1x64x32xf32>
    %146 = vector.broadcast %145 : vector<1x64x32xf32> to vector<2x64x32xf32>
    %147 = arith.mulf %52, %146 : vector<2x64x32xf32>
    %148 = vector.shape_cast %147 : vector<2x64x32xf32> to vector<128x32xf32>
    %149 = arith.truncf %148 : vector<128x32xf32> to vector<128x32xbf16>
    %cst_55 = arith.constant dense<0.000000e+00> : vector<128x32xf32>
    %150 = tpu.matmul %149, %136, %cst_55 {dimension_numbers = #tpu.dot_dimension_numbers<[1], [0], [0], [1], [0, 0, 1, 1], [], []>} : vector<128x32xbf16>, vector<32x32xbf16>, vector<128x32xf32> -> vector<128x32xf32>
    %cst_56 = arith.constant 0.000000e+00 : f32
    %151 = vector.broadcast %cst_56 : f32 to vector<128x32xf32>
    %152 = arith.cmpf ogt, %150, %151 : vector<128x32xf32>
    %cst_57 = arith.constant 2.000000e-01 : f32
    %153 = vector.broadcast %cst_57 : f32 to vector<128x32xf32>
    %154 = arith.mulf %153, %150 : vector<128x32xf32>
    %155 = arith.select %152, %150, %154 : vector<128x32xi1>, vector<128x32xf32>
    %156 = vector.broadcast %138 : vector<1x32xf32> to vector<128x32xf32>
    %157 = arith.mulf %155, %156 : vector<128x32xf32>
    %cst_58 = arith.constant dense<0.000000e+00> : vector<128xf32>
    %158 = vector.multi_reduction <add>, %157, %cst_58 [1] : vector<128x32xf32> to vector<128xf32>
    %159 = vector.shape_cast %158 : vector<128xf32> to vector<128x1xf32>
    %160 = vector.shape_cast %159 : vector<128x1xf32> to vector<2x64x1xf32>
    %161 = vector.extract_strided_slice %160 {offsets = [0, 0, 0], sizes = [1, 64, 1], strides = [1, 1, 1]} : vector<2x64x1xf32> to vector<1x64x1xf32>
    %162 = vector.shape_cast %161 : vector<1x64x1xf32> to vector<64x1xf32>
    %163 = vector.extract_strided_slice %160 {offsets = [1, 0, 0], sizes = [1, 64, 1], strides = [1, 1, 1]} : vector<2x64x1xf32> to vector<1x64x1xf32>
    %164 = vector.shape_cast %163 : vector<1x64x1xf32> to vector<64x1xf32>
    %165 = arith.maximumf %162, %164 : vector<64x1xf32>
    %166 = vector.shape_cast %165 : vector<64x1xf32> to vector<1x64x1xf32>
    %167 = vector.broadcast %166 : vector<1x64x1xf32> to vector<2x64x1xf32>
    %168 = arith.subf %160, %167 : vector<2x64x1xf32>
    %169 = math.exp %168 : vector<2x64x1xf32>
    %170 = vector.extract_strided_slice %169 {offsets = [0, 0, 0], sizes = [1, 64, 1], strides = [1, 1, 1]} : vector<2x64x1xf32> to vector<1x64x1xf32>
    %171 = vector.shape_cast %170 : vector<1x64x1xf32> to vector<64x1xf32>
    %172 = vector.extract_strided_slice %169 {offsets = [1, 0, 0], sizes = [1, 64, 1], strides = [1, 1, 1]} : vector<2x64x1xf32> to vector<1x64x1xf32>
    %173 = vector.shape_cast %172 : vector<1x64x1xf32> to vector<64x1xf32>
    %174 = arith.addf %171, %173 : vector<64x1xf32>
    %175 = vector.broadcast %169 : vector<2x64x1xf32> to vector<2x64x32xf32>
    %176 = arith.mulf %175, %52 : vector<2x64x32xf32>
    %177 = vector.extract_strided_slice %176 {offsets = [0, 0, 0], sizes = [1, 64, 32], strides = [1, 1, 1]} : vector<2x64x32xf32> to vector<1x64x32xf32>
    %178 = vector.shape_cast %177 : vector<1x64x32xf32> to vector<64x32xf32>
    %179 = vector.extract_strided_slice %176 {offsets = [1, 0, 0], sizes = [1, 64, 32], strides = [1, 1, 1]} : vector<2x64x32xf32> to vector<1x64x32xf32>
    %180 = vector.shape_cast %179 : vector<1x64x32xf32> to vector<64x32xf32>
    %181 = arith.addf %178, %180 : vector<64x32xf32>
    %182 = vector.broadcast %174 : vector<64x1xf32> to vector<64x32xf32>
    %183 = arith.divf %181, %182 : vector<64x32xf32>
    %184 = arith.truncf %133 : vector<64x32xf32> to vector<64x32xbf16>
    %cst_59 = arith.constant dense<0.000000e+00> : vector<64x32xf32>
    %185 = tpu.matmul %184, %141, %cst_59 {dimension_numbers = #tpu.dot_dimension_numbers<[1], [0], [0], [1], [0, 0, 1, 1], [], []>} : vector<64x32xbf16>, vector<32x32xbf16>, vector<64x32xf32> -> vector<64x32xf32>
    %186 = arith.truncf %183 : vector<64x32xf32> to vector<64x32xbf16>
    %cst_60 = arith.constant dense<0.000000e+00> : vector<64x32xf32>
    %187 = tpu.matmul %186, %144, %cst_60 {dimension_numbers = #tpu.dot_dimension_numbers<[1], [0], [0], [1], [0, 0, 1, 1], [], []>} : vector<64x32xbf16>, vector<32x32xbf16>, vector<64x32xf32> -> vector<64x32xf32>
    %188 = arith.addf %185, %187 : vector<64x32xf32>
    %cst_61 = arith.constant 0.000000e+00 : f32
    %189 = vector.broadcast %cst_61 : f32 to vector<64x32xf32>
    %190 = arith.maximumf %188, %189 : vector<64x32xf32>
    %191 = vector.shape_cast %190 : vector<64x32xf32> to vector<4x16x32xf32>
    %c1 = arith.constant 1 : index
    %c0_62 = arith.constant 0 : index
    %c0_63 = arith.constant 0 : index
    %192 = vector.load %arg7[%c1, %c0_62, %c0_63] : memref<2x32x32xf32, #tpu.memory_space<vmem>>, vector<1x32x32xf32>
    %193 = vector.shape_cast %192 : vector<1x32x32xf32> to vector<32x32xf32>
    %194 = arith.truncf %193 : vector<32x32xf32> to vector<32x32xbf16>
    %c1_64 = arith.constant 1 : index
    %c0_65 = arith.constant 0 : index
    %c0_66 = arith.constant 0 : index
    %195 = vector.load %arg8[%c1_64, %c0_65, %c0_66] : memref<2x1x32xf32, #tpu.memory_space<vmem>>, vector<1x1x32xf32>
    %196 = vector.shape_cast %195 : vector<1x1x32xf32> to vector<1x32xf32>
    %c1_67 = arith.constant 1 : index
    %c0_68 = arith.constant 0 : index
    %c0_69 = arith.constant 0 : index
    %197 = vector.load %arg9[%c1_67, %c0_68, %c0_69] : memref<2x32x32xf32, #tpu.memory_space<vmem>>, vector<1x32x32xf32>
    %198 = vector.shape_cast %197 : vector<1x32x32xf32> to vector<32x32xf32>
    %199 = arith.truncf %198 : vector<32x32xf32> to vector<32x32xbf16>
    %c1_70 = arith.constant 1 : index
    %c0_71 = arith.constant 0 : index
    %c0_72 = arith.constant 0 : index
    %200 = vector.load %arg10[%c1_70, %c0_71, %c0_72] : memref<2x32x32xf32, #tpu.memory_space<vmem>>, vector<1x32x32xf32>
    %201 = vector.shape_cast %200 : vector<1x32x32xf32> to vector<32x32xf32>
    %202 = arith.truncf %201 : vector<32x32xf32> to vector<32x32xbf16>
    %203 = vector.shape_cast %48 : vector<16x32xf32> to vector<1x16x32xf32>
    %204 = vector.broadcast %203 : vector<1x16x32xf32> to vector<4x16x32xf32>
    %205 = arith.mulf %191, %204 : vector<4x16x32xf32>
    %206 = vector.shape_cast %205 : vector<4x16x32xf32> to vector<64x32xf32>
    %207 = arith.truncf %206 : vector<64x32xf32> to vector<64x32xbf16>
    %cst_73 = arith.constant dense<0.000000e+00> : vector<64x32xf32>
    %208 = tpu.matmul %207, %194, %cst_73 {dimension_numbers = #tpu.dot_dimension_numbers<[1], [0], [0], [1], [0, 0, 1, 1], [], []>} : vector<64x32xbf16>, vector<32x32xbf16>, vector<64x32xf32> -> vector<64x32xf32>
    %cst_74 = arith.constant 0.000000e+00 : f32
    %209 = vector.broadcast %cst_74 : f32 to vector<64x32xf32>
    %210 = arith.cmpf ogt, %208, %209 : vector<64x32xf32>
    %cst_75 = arith.constant 2.000000e-01 : f32
    %211 = vector.broadcast %cst_75 : f32 to vector<64x32xf32>
    %212 = arith.mulf %211, %208 : vector<64x32xf32>
    %213 = arith.select %210, %208, %212 : vector<64x32xi1>, vector<64x32xf32>
    %214 = vector.broadcast %196 : vector<1x32xf32> to vector<64x32xf32>
    %215 = arith.mulf %213, %214 : vector<64x32xf32>
    %cst_76 = arith.constant dense<0.000000e+00> : vector<64xf32>
    %216 = vector.multi_reduction <add>, %215, %cst_76 [1] : vector<64x32xf32> to vector<64xf32>
    %217 = vector.shape_cast %216 : vector<64xf32> to vector<64x1xf32>
    %218 = vector.shape_cast %217 : vector<64x1xf32> to vector<4x16x1xf32>
    %219 = vector.extract_strided_slice %218 {offsets = [0, 0, 0], sizes = [1, 16, 1], strides = [1, 1, 1]} : vector<4x16x1xf32> to vector<1x16x1xf32>
    %220 = vector.shape_cast %219 : vector<1x16x1xf32> to vector<16x1xf32>
    %221 = vector.extract_strided_slice %218 {offsets = [1, 0, 0], sizes = [1, 16, 1], strides = [1, 1, 1]} : vector<4x16x1xf32> to vector<1x16x1xf32>
    %222 = vector.shape_cast %221 : vector<1x16x1xf32> to vector<16x1xf32>
    %223 = arith.maximumf %220, %222 : vector<16x1xf32>
    %224 = vector.extract_strided_slice %218 {offsets = [2, 0, 0], sizes = [1, 16, 1], strides = [1, 1, 1]} : vector<4x16x1xf32> to vector<1x16x1xf32>
    %225 = vector.shape_cast %224 : vector<1x16x1xf32> to vector<16x1xf32>
    %226 = arith.maximumf %223, %225 : vector<16x1xf32>
    %227 = vector.extract_strided_slice %218 {offsets = [3, 0, 0], sizes = [1, 16, 1], strides = [1, 1, 1]} : vector<4x16x1xf32> to vector<1x16x1xf32>
    %228 = vector.shape_cast %227 : vector<1x16x1xf32> to vector<16x1xf32>
    %229 = arith.maximumf %226, %228 : vector<16x1xf32>
    %230 = vector.shape_cast %229 : vector<16x1xf32> to vector<1x16x1xf32>
    %231 = vector.broadcast %230 : vector<1x16x1xf32> to vector<4x16x1xf32>
    %232 = arith.subf %218, %231 : vector<4x16x1xf32>
    %233 = math.exp %232 : vector<4x16x1xf32>
    %234 = vector.extract_strided_slice %233 {offsets = [0, 0, 0], sizes = [1, 16, 1], strides = [1, 1, 1]} : vector<4x16x1xf32> to vector<1x16x1xf32>
    %235 = vector.shape_cast %234 : vector<1x16x1xf32> to vector<16x1xf32>
    %236 = vector.extract_strided_slice %233 {offsets = [1, 0, 0], sizes = [1, 16, 1], strides = [1, 1, 1]} : vector<4x16x1xf32> to vector<1x16x1xf32>
    %237 = vector.shape_cast %236 : vector<1x16x1xf32> to vector<16x1xf32>
    %238 = arith.addf %235, %237 : vector<16x1xf32>
    %239 = vector.extract_strided_slice %233 {offsets = [2, 0, 0], sizes = [1, 16, 1], strides = [1, 1, 1]} : vector<4x16x1xf32> to vector<1x16x1xf32>
    %240 = vector.shape_cast %239 : vector<1x16x1xf32> to vector<16x1xf32>
    %241 = arith.addf %238, %240 : vector<16x1xf32>
    %242 = vector.extract_strided_slice %233 {offsets = [3, 0, 0], sizes = [1, 16, 1], strides = [1, 1, 1]} : vector<4x16x1xf32> to vector<1x16x1xf32>
    %243 = vector.shape_cast %242 : vector<1x16x1xf32> to vector<16x1xf32>
    %244 = arith.addf %241, %243 : vector<16x1xf32>
    %245 = vector.broadcast %233 : vector<4x16x1xf32> to vector<4x16x32xf32>
    %246 = arith.mulf %245, %191 : vector<4x16x32xf32>
    %247 = vector.extract_strided_slice %246 {offsets = [0, 0, 0], sizes = [1, 16, 32], strides = [1, 1, 1]} : vector<4x16x32xf32> to vector<1x16x32xf32>
    %248 = vector.shape_cast %247 : vector<1x16x32xf32> to vector<16x32xf32>
    %249 = vector.extract_strided_slice %246 {offsets = [1, 0, 0], sizes = [1, 16, 32], strides = [1, 1, 1]} : vector<4x16x32xf32> to vector<1x16x32xf32>
    %250 = vector.shape_cast %249 : vector<1x16x32xf32> to vector<16x32xf32>
    %251 = arith.addf %248, %250 : vector<16x32xf32>
    %252 = vector.extract_strided_slice %246 {offsets = [2, 0, 0], sizes = [1, 16, 32], strides = [1, 1, 1]} : vector<4x16x32xf32> to vector<1x16x32xf32>
    %253 = vector.shape_cast %252 : vector<1x16x32xf32> to vector<16x32xf32>
    %254 = arith.addf %251, %253 : vector<16x32xf32>
    %255 = vector.extract_strided_slice %246 {offsets = [3, 0, 0], sizes = [1, 16, 32], strides = [1, 1, 1]} : vector<4x16x32xf32> to vector<1x16x32xf32>
    %256 = vector.shape_cast %255 : vector<1x16x32xf32> to vector<16x32xf32>
    %257 = arith.addf %254, %256 : vector<16x32xf32>
    %258 = vector.broadcast %244 : vector<16x1xf32> to vector<16x32xf32>
    %259 = arith.divf %257, %258 : vector<16x32xf32>
    %260 = arith.truncf %132 : vector<16x32xf32> to vector<16x32xbf16>
    %cst_77 = arith.constant dense<0.000000e+00> : vector<16x32xf32>
    %261 = tpu.matmul %260, %199, %cst_77 {dimension_numbers = #tpu.dot_dimension_numbers<[1], [0], [0], [1], [0, 0, 1, 1], [], []>} : vector<16x32xbf16>, vector<32x32xbf16>, vector<16x32xf32> -> vector<16x32xf32>
    %262 = arith.truncf %259 : vector<16x32xf32> to vector<16x32xbf16>
    %cst_78 = arith.constant dense<0.000000e+00> : vector<16x32xf32>
    %263 = tpu.matmul %262, %202, %cst_78 {dimension_numbers = #tpu.dot_dimension_numbers<[1], [0], [0], [1], [0, 0, 1, 1], [], []>} : vector<16x32xbf16>, vector<32x32xbf16>, vector<16x32xf32> -> vector<16x32xf32>
    %264 = arith.addf %261, %263 : vector<16x32xf32>
    %cst_79 = arith.constant 0.000000e+00 : f32
    %265 = vector.broadcast %cst_79 : f32 to vector<16x32xf32>
    %266 = arith.maximumf %264, %265 : vector<16x32xf32>
    %267 = vector.shape_cast %266 : vector<16x32xf32> to vector<2x8x32xf32>
    %268 = arith.addf %44, %267 : vector<2x8x32xf32>
    %c0_80 = arith.constant 0 : index
    %c0_81 = arith.constant 0 : index
    %c0_82 = arith.constant 0 : index
    %269 = vector.load %arg11[%c0_80, %c0_81, %c0_82] : memref<2x8x32xf32, #tpu.memory_space<vmem>>, vector<2x8x32xf32>
    tpu.vector_store %arg11[%c0_80, %c0_81, %c0_82], %268 {strides = array<i32>} : memref<2x8x32xf32, #tpu.memory_space<vmem>>, vector<2x8x32xf32>,
    return
  }
  func.func @transform_0(%arg0: i32) -> (i32, i32, i32) {
    %c0_i32 = arith.constant 0 : i32
    %c0_i32_0 = arith.constant 0 : i32
    %c0_i32_1 = arith.constant 0 : i32
    return %arg0, %c0_i32, %c0_i32_0 : i32, i32, i32
  }
  func.func @transform_1(%arg0: i32) -> (i32, i32, i32) {
    %c0_i32 = arith.constant 0 : i32
    %c0_i32_0 = arith.constant 0 : i32
    %c0_i32_1 = arith.constant 0 : i32
    return %arg0, %c0_i32, %c0_i32_0 : i32, i32, i32
  }
  func.func @transform_2(%arg0: i32) -> (i32, i32) {
    %c0_i32 = arith.constant 0 : i32
    %c0_i32_0 = arith.constant 0 : i32
    %c0_i32_1 = arith.constant 0 : i32
    return %c0_i32, %c0_i32_0 : i32, i32
  }
  func.func @transform_3(%arg0: i32) -> (i32, i32, i32, i32) {
    %c0_i32 = arith.constant 0 : i32
    %c0_i32_0 = arith.constant 0 : i32
    %c0_i32_1 = arith.constant 0 : i32
    %c0_i32_2 = arith.constant 0 : i32
    return %c0_i32, %arg0, %c0_i32_0, %c0_i32_1 : i32, i32, i32, i32
  }
  func.func @transform_4(%arg0: i32) -> (i32, i32, i32, i32) {
    %c0_i32 = arith.constant 0 : i32
    %c0_i32_0 = arith.constant 0 : i32
    %c0_i32_1 = arith.constant 0 : i32
    %c0_i32_2 = arith.constant 0 : i32
    return %c0_i32, %arg0, %c0_i32_0, %c0_i32_1 : i32, i32, i32, i32
  }
  func.func @transform_5(%arg0: i32) -> (i32, i32, i32) {
    %c0_i32 = arith.constant 0 : i32
    %c0_i32_0 = arith.constant 0 : i32
    %c0_i32_1 = arith.constant 0 : i32
    return %arg0, %c0_i32, %c0_i32_0 : i32, i32, i32
  }
  func.func @transform_6(%arg0: i32) -> (i32, i32, i32) {
    %c0_i32 = arith.constant 0 : i32
    %c0_i32_0 = arith.constant 0 : i32
    %c0_i32_1 = arith.constant 0 : i32
    %c0_i32_2 = arith.constant 0 : i32
    return %c0_i32, %c0_i32_0, %c0_i32_1 : i32, i32, i32
  }
  func.func @transform_7(%arg0: i32) -> (i32, i32, i32) {
    %c0_i32 = arith.constant 0 : i32
    %c0_i32_0 = arith.constant 0 : i32
    %c0_i32_1 = arith.constant 0 : i32
    %c0_i32_2 = arith.constant 0 : i32
    return %c0_i32, %c0_i32_0, %c0_i32_1 : i32, i32, i32
  }
  func.func @transform_8(%arg0: i32) -> (i32, i32, i32) {
    %c0_i32 = arith.constant 0 : i32
    %c0_i32_0 = arith.constant 0 : i32
    %c0_i32_1 = arith.constant 0 : i32
    %c0_i32_2 = arith.constant 0 : i32
    return %c0_i32, %c0_i32_0, %c0_i32_1 : i32, i32, i32
  }
  func.func @transform_9(%arg0: i32) -> (i32, i32, i32) {
    %c0_i32 = arith.constant 0 : i32
    %c0_i32_0 = arith.constant 0 : i32
    %c0_i32_1 = arith.constant 0 : i32
    %c0_i32_2 = arith.constant 0 : i32
    return %c0_i32, %c0_i32_0, %c0_i32_1 : i32, i32, i32
  }
  func.func @transform_10(%arg0: i32) -> (i32, i32, i32) {
    %c0_i32 = arith.constant 0 : i32
    %c0_i32_0 = arith.constant 0 : i32
    %c0_i32_1 = arith.constant 0 : i32
    return %arg0, %c0_i32, %c0_i32_0 : i32, i32, i32
  }
}

</mosaic_0001>

<bundles_post_ra>
// kernel: div.0
= control target key start
LH: loop header
LB: loop body
LE: loop exit
PB: predicated region body
PF: predicated region fallthrough
CT: control target
= control target key end

     0   :  { %s88_s0 = inlined_call_operand.vmem [shape: f32[2,1,32], index: 0, kind: input, shape index: {}]   ;;  %s89_s1 = inlined_call_operand.vmem [shape: f32[2,1,32], index: 1, kind: input, shape index: {}]   ;;  %s90_s2 = inlined_call_operand.vmem [shape: f32[2,1,32], index: 2, kind: output, shape index: {}]  }
   0x1   :  { %v4_v0 = vld [vmem:[%s89_s1] sm:$0x1]  ;;  %v49_v1 = vld [vmem:[%s89_s1 + $0x1] sm:$0x1] }
   0x2   :  { %51 = vrcp.f32 %v4_v0  ;;  %vm12_vm0 = vweird.f32 %v4_v0  ;;  %v18_v5 = vand.u32 2147483648, %v4_v0  ;;  %v16_v8 = vand.u32 2147483647, %v4_v0  ;;  %v3_v17 = vld [vmem:[%s88_s0] sm:$0x1] }
   0x3   :  { %53 = vrcp.f32 %v49_v1  ;;  %v41_v9 = vand.u32 2147483648, %v49_v1  ;;  %vm35_vm2 = vweird.f32 %v49_v1  ;;  %v39_v11 = vand.u32 2147483647, %v49_v1  ;;  %v48_v20 = vld [vmem:[%s88_s0 + $0x1] sm:$0x1] }
   0x4   :  { %v19_v13 = vor.u32 1.1754944e-38, %v18_v5  ;;  %vm17_vm5 = vcmp.eq.f32.partialorder %v16_v8, 8.507059e+37 }
   0x5   :  { %v42_v16 = vor.u32 1.1754944e-38, %v41_v9  ;;  %vm40_vm7 = vcmp.eq.f32.partialorder %v39_v11, 8.507059e+37 }
   0x8   :  { %v52_v2 = vpop.eup %51 }
   0x9   :  { %v54_v3 = vpop.eup %53  ;;  %v8_v4 = vmul.f32 %v52_v2, %v4_v0  ;;  %vm13_vm1 = vweird.f32 %v52_v2 }
   0xa   :  { %v31_v6 = vmul.f32 %v54_v3, %v49_v1  ;;  %vm36_vm3 = vweird.f32 %v54_v3  ;;  %vm14_vm4 = vmor %vm12_vm0, %vm13_vm1 }
   0xb   :  { %v9_v7 = vsub.f32 1.0, %v8_v4  ;;  %vm37_vm6 = vmor %vm35_vm2, %vm36_vm3 }
   0xc   :  { %v32_v10 = vsub.f32 1.0, %v31_v6 }
   0xd   :  { %v10_v12 = vmul.f32 %v52_v2, %v9_v7 }
   0xe   :  { %v33_v14 = vmul.f32 %v54_v3, %v32_v10 }
   0xf   :  { %v11_v15 = vadd.f32 %v52_v2, %v10_v12 }
  0x10   :  { %v34_v18 = vadd.f32 %v54_v3, %v33_v14 }
  0x11   :  { %v15_v19 = vsel %vm14_vm4, %v52_v2, %v11_v15 }
  0x12   :  { %v20_v21 = vsel %vm17_vm5, %v19_v13, %v15_v19  ;;  %v38_v22 = vsel %vm37_vm6, %v54_v3, %v34_v18 }
  0x13   :  { %v21_v23 = vmul.f32 %v20_v21, %v3_v17  ;;  %v43_v24 = vsel %vm40_vm7, %v42_v16, %v38_v22 }
  0x14   :  { %v44_v25 = vmul.f32 %v48_v20, %v43_v24 }
  0x15   :  { %23 = vst [vmem:[%s90_s2] sm:$0x1] %v21_v23 }
  0x16   :  { %50 = vst [vmem:[%s90_s2 + $0x1] sm:$0x1] %v44_v25 }

// kernel: session_graph_forward.1
= control target key start
LH: loop header
LB: loop body
LE: loop exit
PB: predicated region body
PF: predicated region fallthrough
CT: control target
= control target key end

     0   :  { %vm82_vm0 = vcmask 261120   ;;  %s2355_s0 = inlined_call_operand.vmem [shape: f32[2,8,32], index: 0, kind: input, shape index: {}]   ;;  %s2356_s1 = inlined_call_operand.vmem [shape: s32[2,8,8], index: 1, kind: input, shape index: {}]   ;;  %s2357_s2 = inlined_call_operand.vmem [shape: f32[4,32], index: 2, kind: input, shape index: {}]   ;;  %s2358_s3 = inlined_call_operand.vmem [shape: f32[4,2,8,32], index: 3, kind: input, shape index: {}]   ;;  %s2359_s4 = inlined_call_operand.vmem [shape: f32[8,2,8,32], index: 4, kind: input, shape index: {}]   ;;  %s2360_s5 = inlined_call_operand.vmem [shape: f32[2,1,32], index: 5, kind: input, shape index: {}]   ;;  %s2361_s6 = inlined_call_operand.vmem [shape: f32[2,32,32], index: 6, kind: input, shape index: {}]   ;;  %s2362_s7 = inlined_call_operand.vmem [shape: f32[2,1,32], index: 7, kind: input, shape index: {}]   ;;  %s2363_s8 = inlined_call_operand.vmem [shape: f32[2,32,32], index: 8, kind: input, shape index: {}]   ;;  %s2364_s9 = inlined_call_operand.vmem [shape: f32[2,32,32], index: 9, kind: input, shape index: {}]   ;;  %s2365_s10 = inlined_call_operand.hbm [shape: f32[2,8,32], index: 10, kind: output, shape index: {}]  }
   0x1   :  { %v274_v0 = vld [vmem:[%s2361_s6 + $0x10] sm:$0xff]  ;;  %v275_v1 = vld [vmem:[%s2361_s6 + $0x18] sm:$0xff]  ;;  %v37_v2 = vld [vmem:[%s2355_s0] sm:$0xff] }
   0x2   :  { %v277_v3 = vpack.c.bf16 %v275_v1, %v274_v0  ;;  %v1612_v4 = vpack.c.bf16 %v37_v2, %v37_v2  ;;  %v272_v5 = vld [vmem:[%s2361_s6] sm:$0xff]  ;;  %v273_v6 = vld [vmem:[%s2361_s6 + $0x8] sm:$0xff] }
   0x3   :  { %v1623_v7 = vld [vmem:[%s2360_s5] ss:$0 sm:$0xff]  ;;  %v1628_v8 = vld [vmem:[%s2360_s5 + $0x1] ss:$0 sm:$0xff]  ;;  %v276_v10 = vpack.c.bf16 %v273_v6, %v272_v5  ;;  %v1640_v12 = vld [vmem:[%s2358_s3 + $0x8] sm:$0xff] }
   0x4   :  { %321 = vmatpush.bf16.msra.mxu2 %v277_v3  ;;  %v90_v9 = vsel %vm82_vm0, %v1612_v4, 0  ;;  %v1635_v11 = vld [vmem:[%s2358_s3] sm:$0xff]  ;;  %v292_v15 = vmul.f32 %v1628_v8, %v1640_v12 }
   0x5   :  { %v1645_v13 = vld [vmem:[%s2357_s2] sm:$0xf]  ;;  %99 = vmatpush.bf16.xpose.msra.mxu0 %v90_v9  ;;  %v291_v14 = vmul.f32 %v1623_v7, %v1635_v11  ;;  %1393 = vmatpush.bf16.xpose.msra.mxu1 %v90_v9 }
   0x6   :  { %v45_v16 = vrot.slane %v1645_v13, 1  ;;  %v48_v17 = vperm.slane %v1645_v13, 0  ;;  %v46_v18 = vrot.slane %v1645_v13, 2  ;;  %v47_v19 = vrot.slane %v1645_v13, 3 }
   0x7   :  { %v299_v20 = vpack.c.bf16 %v292_v15, %v291_v14 }
   0x8   :  { %v1655_v21 = vperm.slane %v45_v16, 0  ;;  %322 = vmatpush.bf16.msra.mxu2 %v276_v10  ;;  %v56_v22 = vmul.f32 %v48_v17, %v37_v2  ;;  %v1659_v23 = vperm.slane %v46_v18, 0  ;;  %v1661_v24 = vperm.slane %v47_v19, 0 }
   0xd   :  { %575 = vmatpush.bf16.msrb.mxu0 %v277_v3 }
   0xe   :  { %15 = vsyncpa [#allocation3], 0  ;;  %v57_v25 = vmul.f32 %v1655_v21, %v37_v2  ;;  %v64_v26 = vpack.c.bf16 %v56_v22, %v56_v22  ;;  %v58_v27 = vmul.f32 %v1659_v23, %v37_v2  ;;  %v59_v28 = vmul.f32 %v1661_v24, %v37_v2  ;;  %1350 = vmatmul.msk.bf16.vlgmr.msra.gmra.mxu2 %vm82_vm0, %v299_v20  ;;  %v1670_v38 = vld [vmem:[%s2358_s3 + $0x10] sm:$0xff]  ;;  %v1675_v39 = vld [vmem:[%s2358_s3 + $0x18] sm:$0xff]  ;;  %s1334_s14 = sshll.u32 %s2365_s10, 4  ;;  %s1546_s15 = smov 128   ;;  %s1335_s14 = int_to_ptr.hbm [resolvable:$true] %s1334_s14 }
   0xf   :  { %v293_v40 = vmul.f32 %v1623_v7, %v1670_v38  ;;  %v294_v41 = vmul.f32 %v1628_v8, %v1675_v39  ;;  %v1686_v42 = vld [vmem:[%s2359_s4] sm:$0xff]  ;;  %v1691_v43 = vld [vmem:[%s2359_s4 + $0x8] sm:$0xff]  ;;  %v258_v52 = vld [vmem:[%s2359_s4 + $0x10] sm:$0xff]  ;;  %s1547_s16 = smov 8  }
  0x10   :  { %v65_v29 = vpack.c.bf16 %v57_v25, %v57_v25  ;;  %v76_v30 = vunpack.c.l.b16 %v64_v26  ;;  %v66_v31 = vpack.c.bf16 %v58_v27, %v58_v27  ;;  %v67_v32 = vpack.c.bf16 %v59_v28, %v59_v28  ;;  %v1701_v48 = vld [vmem:[%s2358_s3 + $0x20] sm:$0xff]  ;;  %v1706_v49 = vld [vmem:[%s2358_s3 + $0x28] sm:$0xff]  ;;  %v259_v53 = vld [vmem:[%s2359_s4 + $0x18] sm:$0xff] }
  0x11   :  { %576 = vmatpush.bf16.msrb.mxu0 %v276_v10  ;;  %v300_v44 = vpack.c.bf16 %v294_v41, %v293_v40  ;;  %v521_v45 = vmul.f32 %v1623_v7, %v1686_v42  ;;  %v522_v46 = vmul.f32 %v1628_v8, %v1691_v43  ;;  %v295_v50 = vmul.f32 %v1623_v7, %v1701_v48  ;;  %v1725_v58 = vld [vmem:[%s2358_s3 + $0x30] sm:$0xff]  ;;  %v1730_v59 = vld [vmem:[%s2358_s3 + $0x38] sm:$0xff]  ;;  %v260_v62 = vld [vmem:[%s2359_s4 + $0x20] sm:$0xff] }
  0x12   :  { %v77_v33 = vunpack.c.l.b16 %v65_v29  ;;  %v78_v34 = vunpack.c.l.b16 %v66_v31  ;;  %v79_v35 = vunpack.c.l.b16 %v67_v32  ;;  %v296_v51 = vmul.f32 %v1628_v8, %v1706_v49  ;;  %v261_v63 = vld [vmem:[%s2359_s4 + $0x28] sm:$0xff]  ;;  %v262_v5 = vld [vmem:[%s2359_s4 + $0x30] sm:$0xff]  ;;  %v263_v6 = vld [vmem:[%s2359_s4 + $0x38] sm:$0xff] }
  0x13   :  { %v537_v47 = vpack.c.bf16 %v522_v46, %v521_v45  ;;  %v523_v55 = vmul.f32 %v1623_v7, %v258_v52  ;;  %v524_v56 = vmul.f32 %v1628_v8, %v259_v53  ;;  %v297_v60 = vmul.f32 %v1623_v7, %v1725_v58  ;;  %v1759_v15 = vld [vmem:[%s2359_s4 + $0x40] sm:$0xff]  ;;  %v1764_v16 = vld [vmem:[%s2359_s4 + $0x48] sm:$0xff]  ;;  %v1774_v22 = vld [vmem:[%s2359_s4 + $0x50] sm:$0xff] }
  0x14   :  { %v80_v36 = vpack.c.b16 %v77_v33, %v76_v30  ;;  %v81_v37 = vpack.c.b16 %v79_v35, %v78_v34  ;;  %v301_v54 = vpack.c.bf16 %v296_v51, %v295_v50  ;;  %v298_v61 = vmul.f32 %v1628_v8, %v1730_v59  ;;  %v267_v25 = vld [vmem:[%s2359_s4 + $0x58] sm:$0xff]  ;;  %v268_v29 = vld [vmem:[%s2359_s4 + $0x60] sm:$0xff]  ;;  %v269_v30 = vld [vmem:[%s2359_s4 + $0x68] sm:$0xff] }
  0x15   :  { %v538_v57 = vpack.c.bf16 %v524_v56, %v523_v55  ;;  %v525_v1 = vmul.f32 %v1623_v7, %v260_v62  ;;  %v526_v2 = vmul.f32 %v1628_v8, %v261_v63  ;;  %v527_v9 = vmul.f32 %v1623_v7, %v262_v5  ;;  %v270_v34 = vld [vmem:[%s2359_s4 + $0x70] sm:$0xff]  ;;  %v271_v35 = vld [vmem:[%s2359_s4 + $0x78] sm:$0xff]  ;;  %v1803_v45 = vld [vmem:[%s2362_s7] ss:$0 sm:$0xff] }
  0x16   :  { %1346 = vmatmul.msk.bf16.vlgmr.msra.gmra.mxu0 %vm82_vm0, %v80_v36  ;;  %1347 = vmatmul.msk.bf16.vlgmr.msra.gmra.mxu1 %vm82_vm0, %v81_v37  ;;  %v302_v0 = vpack.c.bf16 %v298_v61, %v297_v60  ;;  %v528_v10 = vmul.f32 %v1628_v8, %v263_v6  ;;  %v529_v18 = vmul.f32 %v1623_v7, %v1759_v15  ;;  %v1808_v50 = vld [vmem:[%s2356_s1] sm:$0xff] }
  0x17   :  { %v539_v3 = vpack.c.bf16 %v526_v2, %v525_v1  ;;  %v530_v19 = vmul.f32 %v1628_v8, %v1764_v16  ;;  %v531_v26 = vmul.f32 %v1623_v7, %v1774_v22  ;;  %v532_v27 = vmul.f32 %v1628_v8, %v267_v25 }
  0x18   :  { %v540_v14 = vpack.c.bf16 %v528_v10, %v527_v9  ;;  %v533_v31 = vmul.f32 %v1623_v7, %v268_v29  ;;  %v534_v32 = vmul.f32 %v1628_v8, %v269_v30  ;;  %v535_v36 = vmul.f32 %v1623_v7, %v270_v34 }
  0x19   :  { %v541_v20 = vpack.c.bf16 %v530_v19, %v529_v18  ;;  %v542_v28 = vpack.c.bf16 %v532_v27, %v531_v26  ;;  %v536_v37 = vmul.f32 %v1628_v8, %v271_v35  ;;  %vm173_vm3 = vcmp.eq.s32.totalorder %v1808_v50, 1  ;;  %v1830_v35 = vld [vmem:[%s2355_s0 + $0x8] sm:$0xff] }
  0x1a   :  { %v543_v33 = vpack.c.bf16 %v534_v32, %v533_v31  ;;  %vm177_vm4 = vcmp.eq.s32.totalorder %v1808_v50, 2 }
  0x1b   :  { %v544_v40 = vpack.c.bf16 %v536_v37, %v535_v36 }
  0x1e   :  { %1351 = vmatmul.msk.bf16.gmra.mxu2 %vm82_vm0, %v300_v44 }
  0x26   :  { %1356 = vmatmul.msk.bf16.vlgmr.msrb.gmra.mxu0 %vm82_vm0, %v537_v47 }
  0x2e   :  { %1352 = vmatmul.msk.bf16.gmra.mxu2 %vm82_vm0, %v301_v54 }
  0x36   :  { %1357 = vmatmul.msk.bf16.gmra.mxu0 %vm82_vm0, %v538_v57 }
  0x3e   :  { %1353 = vmatmul.msk.bf16.gmra.mxu2 %vm82_vm0, %v302_v0 }
  0x46   :  { %1358 = vmatmul.msk.bf16.gmra.mxu0 %vm82_vm0, %v539_v3 }
  0x56   :  { %1359 = vmatmul.msk.bf16.gmra.mxu0 %vm82_vm0, %v540_v14 }
  0x66   :  { %1360 = vmatmul.msk.bf16.gmra.mxu0 %vm82_vm0, %v541_v20 }
  0x76   :  { %1361 = vmatmul.msk.bf16.gmra.mxu0 %vm82_vm0, %v542_v28 }
  0x86   :  { %1362 = vmatmul.msk.bf16.gmra.mxu0 %vm82_vm0, %v543_v33 }
  0x91   :  { %v324_v44 = vpop.f32.mrf.mxu2 }
  0x92   :  { %vm344_vm1 = vcmp.gt.f32.partialorder %v324_v44, 0.0  ;;  %v352_v47 = vmul.f32 0.2, %v324_v44 }
  0x93   :  { %v101_v41 = vpop.f32.mrf.mxu0 }
  0x94   :  { %v157_v46 = vmul.f32 0.2, %v101_v41  ;;  %vm149_vm2 = vcmp.gt.f32.partialorder %v101_v41, 0.0  ;;  %v360_v7 = vsel %vm344_vm1, %v324_v44, %v352_v47 }
  0x95   :  { %v371_v8 = vmul.f32 %v1803_v45, %v360_v7  ;;  %v60_v7 = vmul.f32 %v48_v17, %v1830_v35 }
  0x96   :  { %1363 = vmatmul.msk.bf16.gmra.mxu0 %vm82_vm0, %v544_v40  ;;  %v165_v51 = vsel %vm149_vm2, %v101_v41, %v157_v46  ;;  %v1834_v40 = vpack.c.bf16 %v1830_v35, %v1830_v35 }
  0x97   :  { %v379_v52 = vsel %vm82_vm0, %v371_v8, 0.0  ;;  %v175_v53 = vsel %vm173_vm3, %v165_v51, -9e+15  ;;  %v61_v8 = vmul.f32 %v1655_v21, %v1830_v35 }
  0x98   :  { %380 = vadd.xlane.f32.xlu0 %v379_v52  ;;  %v128_v44 = vsel %vm82_vm0, %v1834_v40, 0 }
  0x99   :  { %v326_v55 = vpop.f32.mrf.mxu2  ;;  %137 = vmatpush.bf16.xpose.msrb.mxu1 %v128_v44 }
  0x9a   :  { %vm345_vm6 = vcmp.gt.f32.partialorder %v326_v55, 0.0  ;;  %v353_v57 = vmul.f32 0.2, %v326_v55 }
  0x9b   :  { %v103_v54 = vpop.f32.mrf.mxu0 }
  0x9c   :  { %vm150_vm5 = vcmp.gt.f32.partialorder %v103_v54, 0.0  ;;  %v158_v56 = vmul.f32 0.2, %v103_v54  ;;  %v361_v61 = vsel %vm345_vm6, %v326_v55, %v353_v57  ;;  %v68_v55 = vpack.c.bf16 %v60_v7, %v60_v7 }
  0x9d   :  { %v372_v63 = vmul.f32 %v1803_v45, %v361_v61 }
  0x9e   :  { %v166_v60 = vsel %vm150_vm5, %v103_v54, %v158_v56  ;;  %v69_v56 = vpack.c.bf16 %v61_v8, %v61_v8 }
  0x9f   :  { %v1815_v62 = vsel %vm177_vm4, %v166_v60, %v175_v53  ;;  %v382_v0 = vsel %vm82_vm0, %v372_v63, 0.0  ;;  %v115_v63 = vunpack.c.l.b16 %v68_v55 }
  0xa0   :  { %383 = vadd.xlane.f32.xlu0 %v382_v0  ;;  %v116_v13 = vunpack.c.l.b16 %v69_v56 }
  0xa1   :  { %v329_v2 = vpop.f32.mrf.mxu2 }
  0xa2   :  { %vm346_vm7 = vcmp.gt.f32.partialorder %v329_v2, 0.0  ;;  %v354_v3 = vmul.f32 0.2, %v329_v2  ;;  %v119_v0 = vpack.c.b16 %v116_v13, %v115_v63 }
  0xa3   :  { %v578_v1 = vpop.f32.mrf.mxu0 }
  0xa4   :  { %v362_v5 = vsel %vm346_vm7, %v329_v2, %v354_v3  ;;  %v634_v36 = vmul.f32 0.2, %v578_v1  ;;  %vm618_vm11 = vcmp.gt.f32.partialorder %v578_v1, 0.0  ;;  %1348 = vmatmul.msk.bf16.vlgmr.msrb.gmra.mxu1 %vm82_vm0, %v119_v0 }
  0xa5   :  { %v373_v6 = vmul.f32 %v1803_v45, %v362_v5 }
  0xa6   :  { %v650_v47 = vsel %vm618_vm11, %v578_v1, %v634_v36 }
  0xa7   :  { %v385_v9 = vsel %vm82_vm0, %v373_v6, 0.0  ;;  %v666_v54 = vmul.f32 %v1803_v45, %v650_v47 }
  0xa8   :  { %386 = vadd.xlane.f32.xlu1 %v385_v9 }
  0xa9   :  { %v331_v14 = vpop.f32.mrf.mxu2  ;;  %v682_v21 = vsel %vm82_vm0, %v666_v54, 0.0 }
  0xaa   :  { %vm347_vm8 = vcmp.gt.f32.partialorder %v331_v14, 0.0  ;;  %v355_v18 = vmul.f32 0.2, %v331_v14 }
  0xab   :  { %v580_v10 = vpop.f32.mrf.mxu0 }
  0xac   :  { %v363_v19 = vsel %vm347_vm8, %v331_v14, %v355_v18  ;;  %v635_v57 = vmul.f32 0.2, %v580_v10  ;;  %vm619_vm13 = vcmp.gt.f32.partialorder %v580_v10, 0.0 }
  0xad   :  { %v374_v20 = vmul.f32 %v1803_v45, %v363_v19 }
  0xae   :  { %v651_v1 = vsel %vm619_vm13, %v580_v10, %v635_v57 }
  0xaf   :  { %v388_v25 = vsel %vm82_vm0, %v374_v20, 0.0  ;;  %v667_v6 = vmul.f32 %v1803_v45, %v651_v1 }
  0xb0   :  { %389 = vadd.xlane.f32.xlu1 %v388_v25  ;;  %v62_v25 = vmul.f32 %v1659_v23, %v1830_v35 }
  0xb1   :  { %v334_v27 = vpop.f32.mrf.mxu2  ;;  %v685_v20 = vsel %vm82_vm0, %v667_v6, 0.0 }
  0xb2   :  { %vm348_vm9 = vcmp.gt.f32.partialorder %v334_v27, 0.0  ;;  %v356_v28 = vmul.f32 0.2, %v334_v27 }
  0xb3   :  { %v583_v26 = vpop.f32.mrf.mxu0 }
  0xb4   :  { %v364_v29 = vsel %vm348_vm9, %v334_v27, %v356_v28  ;;  %v636_v9 = vmul.f32 0.2, %v583_v26  ;;  %vm620_vm15 = vcmp.gt.f32.partialorder %v583_v26, 0.0  ;;  %v63_v27 = vmul.f32 %v1661_v24, %v1830_v35 }
  0xb5   :  { %v375_v30 = vmul.f32 %v1803_v45, %v364_v29  ;;  %v70_v29 = vpack.c.bf16 %v62_v25, %v62_v25 }
  0xb6   :  { %v652_v10 = vsel %vm620_vm15, %v583_v26, %v636_v9  ;;  %vm181_vm15 = vcmp.eq.s32.totalorder %v1808_v50, 3 }
  0xb7   :  { %v391_v31 = vsel %vm82_vm0, %v375_v30, 0.0  ;;  %v71_v30 = vpack.c.bf16 %v63_v27, %v63_v27 }
  0xb8   :  { %392 = vadd.xlane.f32.xlu2 %v391_v31  ;;  %v668_v31 = vmul.f32 %v1803_v45, %v652_v10 }
  0xb9   :  { %v336_v33 = vpop.f32.mrf.mxu2 }
  0xba   :  { %vm349_vm10 = vcmp.gt.f32.partialorder %v336_v33, 0.0  ;;  %v357_v34 = vmul.f32 0.2, %v336_v33 }
  0xbb   :  { %v1825_v32 = vpop.f32.mrf.mxu0 }
  0xbc   :  { %v365_v37 = vsel %vm349_vm10, %v336_v33, %v357_v34  ;;  %v117_v33 = vunpack.c.l.b16 %v70_v29  ;;  %v118_v34 = vunpack.c.l.b16 %v71_v30  ;;  %v637_v24 = vmul.f32 0.2, %v1825_v32 }
  0xbd   :  { %v376_v41 = vmul.f32 %v1803_v45, %v365_v37  ;;  %v688_v37 = vsel %vm82_vm0, %v668_v31, 0.0  ;;  %vm621_vm2 = vcmp.gt.f32.partialorder %v1825_v32, 0.0 }
  0xbe   :  { %v120_v36 = vpack.c.b16 %v118_v34, %v117_v33  ;;  %v653_v7 = vsel %vm621_vm2, %v1825_v32, %v637_v24 }
  0xbf   :  { %v394_v46 = vsel %vm82_vm0, %v376_v41, 0.0 }
  0xc0   :  { %395 = vadd.xlane.f32.xlu2 %v394_v46  ;;  %1349 = vmatmul.msk.bf16.gmra.mxu1 %vm82_vm0, %v120_v36 }
  0xc1   :  { %v339_v52 = vpop.f32.mrf.mxu2 }
  0xc2   :  { %vm350_vm12 = vcmp.gt.f32.partialorder %v339_v52, 0.0  ;;  %v358_v53 = vmul.f32 0.2, %v339_v52 }
  0xc3   :  { %v1845_v51 = vpop.f32.mrf.mxu0 }
  0xc4   :  { %v366_v60 = vsel %vm350_vm12, %v339_v52, %v358_v53  ;;  %v669_v53 = vmul.f32 %v1803_v45, %v653_v7  ;;  %v638_v54 = vmul.f32 0.2, %v1845_v51  ;;  %vm622_vm4 = vcmp.gt.f32.partialorder %v1845_v51, 0.0 }
  0xc5   :  { %v377_v61 = vmul.f32 %v1803_v45, %v366_v60 }
  0xc6   :  { %v691_v57 = vsel %vm82_vm0, %v669_v53, 0.0  ;;  %v654_v32 = vsel %vm622_vm4, %v1845_v51, %v638_v54 }
  0xc7   :  { %v397_v17 = vsel %vm82_vm0, %v377_v61, 0.0  ;;  %v670_v13 = vmul.f32 %v1803_v45, %v654_v32 }
  0xc8   :  { %398 = vadd.xlane.f32.xlu0 %v397_v17  ;;  %683 = vadd.xlane.f32.xlu2 %v682_v21 }
  0xc9   :  { %v341_v3 = vpop.f32.mrf.mxu2  ;;  %v694_v1 = vsel %vm82_vm0, %v670_v13, 0.0 }
  0xca   :  { %vm351_vm14 = vcmp.gt.f32.partialorder %v341_v3, 0.0  ;;  %v359_v5 = vmul.f32 0.2, %v341_v3 }
  0xcb   :  { %v1851_v2 = vpop.f32.mrf.mxu0 }
  0xcc   :  { %v367_v14 = vsel %vm351_vm14, %v341_v3, %v359_v5  ;;  %v639_v17 = vmul.f32 0.2, %v1851_v2  ;;  %vm623_vm6 = vcmp.gt.f32.partialorder %v1851_v2, 0.0 }
  0xcd   :  { %v378_v18 = vmul.f32 %v1803_v45, %v367_v14 }
  0xce   :  { %v655_v51 = vsel %vm623_vm6, %v1851_v2, %v639_v17 }
  0xcf   :  { %v400_v19 = vsel %vm82_vm0, %v378_v18, 0.0  ;;  %v671_v9 = vmul.f32 %v1803_v45, %v655_v51 }
  0xd0   :  { %401 = vadd.xlane.f32.xlu1 %v400_v19  ;;  %686 = vadd.xlane.f32.xlu0 %v685_v20 }
  0xd1   :  { %v697_v20 = vsel %vm82_vm0, %v671_v9, 0.0 }
  0xd3   :  { %v593_v28 = vpop.f32.mrf.mxu0 }
  0xd4   :  { %v640_v14 = vmul.f32 0.2, %v593_v28  ;;  %vm624_vm8 = vcmp.gt.f32.partialorder %v593_v28, 0.0 }
  0xd6   :  { %v656_v25 = vsel %vm624_vm8, %v593_v28, %v640_v14 }
  0xd7   :  { %v672_v29 = vmul.f32 %v1803_v45, %v656_v25 }
  0xd8   :  { %689 = vadd.xlane.f32.xlu0 %v688_v37  ;;  %v106_v37 = vpop.f32.mrf.mxu1 }
  0xd9   :  { %v700_v34 = vsel %vm82_vm0, %v672_v29, 0.0  ;;  %vm151_vm13 = vcmp.gt.f32.partialorder %v106_v37, 0.0 }
  0xdb   :  { %v1864_v41 = vpop.f32.mrf.mxu0 }
  0xdc   :  { %v641_v30 = vmul.f32 0.2, %v1864_v41  ;;  %vm625_vm10 = vcmp.gt.f32.partialorder %v1864_v41, 0.0 }
  0xde   :  { %v657_v28 = vsel %vm625_vm10, %v1864_v41, %v641_v30 }
  0xdf   :  { %v673_v24 = vmul.f32 %v1803_v45, %v657_v28 }
  0xe0   :  { %v108_v53 = vpop.f32.mrf.mxu1 }
  0xe1   :  { %vm152_vm14 = vcmp.gt.f32.partialorder %v108_v53, 0.0 }
  0xe3   :  { %v598_v26 = vpop.f32.mrf.mxu0 }
  0xe4   :  { %vm626_vm1 = vcmp.gt.f32.partialorder %v598_v26, 0.0  ;;  %v642_v23 = vmul.f32 0.2, %v598_v26 }
  0xe6   :  { %v658_v44 = vsel %vm626_vm1, %v598_v26, %v642_v23  ;;  %vm185_vm1 = vcmp.eq.s32.totalorder %v1808_v50, 4 }
  0xe7   :  { %v674_v46 = vmul.f32 %v1803_v45, %v658_v44 }
  0xe9   :  { %v706_v47 = vsel %vm82_vm0, %v674_v46, 0.0 }
  0xea   :  { %707 = vadd.xlane.f32.xlu1 %v706_v47  ;;  %v703_v47 = vsel %vm82_vm0, %v673_v24, 0.0 }
  0xeb   :  { %v600_v8 = vpop.f32.mrf.mxu0 }
  0xec   :  { %vm627_vm3 = vcmp.gt.f32.partialorder %v600_v8, 0.0  ;;  %v643_v52 = vmul.f32 0.2, %v600_v8 }
  0xee   :  { %v659_v55 = vsel %vm627_vm3, %v600_v8, %v643_v52  ;;  %v159_v52 = vmul.f32 0.2, %v106_v37  ;;  %vm189_vm3 = vcmask 64512  }
  0xef   :  { %v675_v56 = vmul.f32 %v1803_v45, %v659_v55  ;;  %v160_v55 = vmul.f32 0.2, %v108_v53 }
  0xf1   :  { %v709_v60 = vsel %vm82_vm0, %v675_v56, 0.0  ;;  %v168_v32 = vsel %vm152_vm14, %v108_v53, %v160_v55 }
  0xf2   :  { %692 = vadd.xlane.f32.xlu1 %v691_v57  ;;  %710 = vadd.xlane.f32.xlu2 %v709_v60  ;;  %v167_v57 = vsel %vm151_vm13, %v106_v37, %v159_v52 }
  0xf3   :  { %v603_v61 = vpop.f32.mrf.mxu0 }
  0xf4   :  { %vm628_vm5 = vcmp.gt.f32.partialorder %v603_v61, 0.0  ;;  %v644_v63 = vmul.f32 0.2, %v603_v61 }
  0xf6   :  { %v660_v21 = vsel %vm628_vm5, %v603_v61, %v644_v63  ;;  %v183_v63 = vsel %vm181_vm15, %v167_v57, %v1815_v62 }
  0xf7   :  { %v676_v0 = vmul.f32 %v1803_v45, %v660_v21  ;;  %v1906_v21 = vsel %vm185_vm1, %v168_v32, %v183_v63  ;;  %v285_v32 = vld [vmem:[%s2364_s9] sm:$0xff] }
  0xf9   :  { %v712_v3 = vsel %vm82_vm0, %v676_v0, 0.0 }
  0xfa   :  { %695 = vadd.xlane.f32.xlu1 %v694_v1  ;;  %713 = vadd.xlane.f32.xlu2 %v712_v3  ;;  %v190_v3 = vsel %vm189_vm3, %v1906_v21, -inf }
  0xfb   :  { %v605_v5 = vpop.f32.mrf.mxu0 }
  0xfc   :  { %vm629_vm7 = vcmp.gt.f32.partialorder %v605_v5, 0.0  ;;  %v645_v6 = vmul.f32 0.2, %v605_v5 }
  0xfe   :  { %v661_v18 = vsel %vm629_vm7, %v605_v5, %v645_v6 }
  0xff   :  { %v677_v19 = vmul.f32 %v1803_v45, %v661_v18 }
 0x101   :  { %v715_v10 = vsel %vm82_vm0, %v677_v19, 0.0 }
 0x102   :  { %698 = vadd.xlane.f32.xlu2 %v697_v20  ;;  %716 = vadd.xlane.f32.xlu0 %v715_v10 }
 0x103   :  { %v608_v27 = vpop.f32.mrf.mxu0 }
 0x104   :  { %vm630_vm9 = vcmp.gt.f32.partialorder %v608_v27, 0.0  ;;  %v646_v2 = vmul.f32 0.2, %v608_v27 }
 0x106   :  { %v662_v31 = vsel %vm630_vm9, %v608_v27, %v646_v2 }
 0x107   :  { %v678_v33 = vmul.f32 %v1803_v45, %v662_v31 }
 0x109   :  { %v718_v36 = vsel %vm82_vm0, %v678_v33, 0.0 }
 0x10a   :  { %701 = vadd.xlane.f32.xlu2 %v700_v34  ;;  %719 = vadd.xlane.f32.xlu0 %v718_v36 }
 0x10b   :  { %v610_v26 = vpop.f32.mrf.mxu0  ;;  %v381_v51 = vpop.xlane.xlu0 %380 }
 0x10c   :  { %vm631_vm11 = vcmp.gt.f32.partialorder %v610_v26, 0.0  ;;  %v647_v23 = vmul.f32 0.2, %v610_v26 }
 0x10e   :  { %v663_v44 = vsel %vm631_vm11, %v610_v26, %v647_v23 }
 0x10f   :  { %v679_v46 = vmul.f32 %v1803_v45, %v663_v44 }
 0x111   :  { %v721_v7 = vsel %vm82_vm0, %v679_v46, 0.0  ;;  %v287_v46 = vld [vmem:[%s2364_s9 + $0x10] sm:$0xff] }
 0x112   :  { %704 = vadd.xlane.f32.xlu0 %v703_v47  ;;  %722 = vadd.xlane.f32.xlu1 %v721_v7  ;;  %v288_v47 = vld [vmem:[%s2364_s9 + $0x18] sm:$0xff] }
 0x113   :  { %v613_v8 = vpop.f32.mrf.mxu0  ;;  %v384_v62 = vpop.xlane.xlu0 %383  ;;  %v290_v53 = vpack.c.bf16 %v288_v47, %v287_v46 }
 0x114   :  { %vm632_vm12 = vcmp.gt.f32.partialorder %v613_v8, 0.0  ;;  %v648_v54 = vmul.f32 0.2, %v613_v8 }
 0x115   :  { %494 = vmatpush.bf16.msra.mxu3 %v290_v53  ;;  %964 = vmatpush.bf16.msra.mxu1 %v290_v53 }
 0x116   :  { %v664_v41 = vsel %vm632_vm12, %v613_v8, %v648_v54 }
 0x117   :  { %v680_v56 = vmul.f32 %v1803_v45, %v664_v41 }
 0x119   :  { %v724_v60 = vsel %vm82_vm0, %v680_v56, 0.0 }
 0x11a   :  { %725 = vadd.xlane.f32.xlu1 %v724_v60 }
 0x11b   :  { %v615_v61 = vpop.f32.mrf.mxu0  ;;  %v387_v5 = vpop.xlane.xlu1 %386 }
 0x11c   :  { %vm633_vm2 = vcmp.gt.f32.partialorder %v615_v61, 0.0  ;;  %v649_v13 = vmul.f32 0.2, %v615_v61  ;;  %v403_v50 = vmax.f32 %v381_v51, %v387_v5 }
 0x11e   :  { %v665_v17 = vsel %vm633_vm2, %v615_v61, %v649_v13  ;;  %v286_v61 = vld [vmem:[%s2364_s9 + $0x8] sm:$0xff] }
 0x11f   :  { %v681_v0 = vmul.f32 %v1803_v45, %v665_v17  ;;  %v289_v13 = vpack.c.bf16 %v286_v61, %v285_v32 }
 0x121   :  { %v727_v1 = vsel %vm82_vm0, %v681_v0, 0.0  ;;  %v1912_v44 = vpop.f32.mrf.mxu1  ;;  %495 = vmatpush.bf16.msra.mxu3 %v289_v13  ;;  %965 = vmatpush.bf16.msra.mxu1 %v289_v13 }
 0x122   :  { %728 = vadd.xlane.f32.xlu2 %v727_v1  ;;  %191 = vmax.xlane.f32.xlu1 %v190_v3  ;;  %v161_v46 = vmul.f32 0.2, %v1912_v44  ;;  %vm153_vm6 = vcmp.gt.f32.partialorder %v1912_v44, 0.0 }
 0x123   :  { %v390_v14 = vpop.xlane.xlu1 %389 }
 0x124   :  { %v404_v2 = vmax.f32 %v384_v62, %v390_v14 }
 0x129   :  { %v1929_v1 = vpop.f32.mrf.mxu1 }
 0x12a   :  { %vm154_vm9 = vcmp.gt.f32.partialorder %v1929_v1, 0.0 }
 0x12b   :  { %v393_v6 = vpop.xlane.xlu2 %392 }
 0x12c   :  { %v405_v9 = vmax.f32 %v403_v50, %v393_v6 }
 0x133   :  { %v396_v45 = vpop.xlane.xlu2 %395 }
 0x134   :  { %v406_v33 = vmax.f32 %v404_v2, %v396_v45 }
 0x13b   :  { %v399_v18 = vpop.xlane.xlu0 %398 }
 0x13c   :  { %v407_v19 = vmax.f32 %v405_v9, %v399_v18 }
 0x13e   :  { %v409_v20 = vsub.f32 %v381_v51, %v407_v19  ;;  %v411_v10 = vsub.f32 %v387_v5, %v407_v19  ;;  %v413_v25 = vsub.f32 %v393_v6, %v407_v19  ;;  %v415_v27 = vsub.f32 %v399_v18, %v407_v19 }
 0x140   :  { %v417_v29 = vmul.f32 1.442695, %v409_v20  ;;  %v421_v30 = vmul.f32 1.442695, %v411_v10  ;;  %v425_v31 = vmul.f32 1.442695, %v413_v25 }
 0x141   :  { %v429_v34 = vmul.f32 1.442695, %v415_v27  ;;  %v144_v27 = vpop.f32.mrf.mxu1 }
 0x142   :  { %1401 = vpow2.f32 %v417_v29  ;;  %vm155_vm12 = vcmp.gt.f32.partialorder %v144_v27, 0.0 }
 0x143   :  { %1403 = vpow2.f32 %v421_v30  ;;  %v402_v36 = vpop.xlane.xlu1 %401  ;;  %v687_v61 = vpop.xlane.xlu0 %686 }
 0x144   :  { %v408_v37 = vmax.f32 %v406_v33, %v402_v36  ;;  %1405 = vpow2.f32 %v425_v31 }
 0x145   :  { %1407 = vpow2.f32 %v429_v34 }
 0x146   :  { %v410_v28 = vsub.f32 %v384_v62, %v408_v37  ;;  %v412_v26 = vsub.f32 %v390_v14, %v408_v37  ;;  %v414_v23 = vsub.f32 %v396_v45, %v408_v37  ;;  %v416_v24 = vsub.f32 %v402_v36, %v408_v37  ;;  %v282_v45 = vld [vmem:[%s2363_s8 + $0x18] sm:$0xff] }
 0x148   :  { %v1402_v7 = vpop.eup %1401  ;;  %v419_v8 = vmul.f32 1.442695, %v410_v28  ;;  %v423_v52 = vmul.f32 1.442695, %v412_v26  ;;  %v427_v41 = vmul.f32 1.442695, %v414_v23 }
 0x149   :  { %v1404_v54 = vpop.eup %1403  ;;  %v431_v57 = vmul.f32 1.442695, %v416_v24  ;;  %v439_v62 = vmul.f32 %v1402_v7, %v1635_v11  ;;  %v280_v23 = vld [vmem:[%s2363_s8 + $0x8] sm:$0xff] }
 0x14a   :  { %v433_v55 = vadd.f32 %v1404_v54, %v1402_v7  ;;  %1409 = vpow2.f32 %v419_v8  ;;  %v1406_v56 = vpop.eup %1405  ;;  %v441_v6 = vmul.f32 %v1404_v54, %v1670_v38  ;;  %v281_v38 = vld [vmem:[%s2363_s8 + $0x10] sm:$0xff]  ;;  %v162_v54 = vmul.f32 0.2, %v1929_v1 }
 0x14b   :  { %1411 = vpow2.f32 %v423_v52  ;;  %v1408_v63 = vpop.eup %1407  ;;  %v443_v2 = vmul.f32 %v1406_v56, %v1701_v48  ;;  %v1950_v30 = vpack.c.bf16 %v282_v45, %v281_v38  ;;  %v40_v52 = vld [vmem:[%s2356_s1 + $0x8] sm:$0xff] }
 0x14c   :  { %v435_v60 = vadd.f32 %v1406_v56, %v433_v55  ;;  %1413 = vpow2.f32 %v427_v41  ;;  %v447_v19 = vadd.f32 %v441_v6, %v439_v62  ;;  %vm174_vm7 = vcmp.eq.s32.totalorder %v40_v52, 1 }
 0x14d   :  { %1415 = vpow2.f32 %v431_v57  ;;  %511 = vmatpush.bf16.msrb.mxu3 %v1950_v30  ;;  %vm178_vm10 = vcmp.eq.s32.totalorder %v40_v52, 2  ;;  %v163_v6 = vmul.f32 0.2, %v144_v27  ;;  %vm182_vm15 = vcmp.eq.s32.totalorder %v40_v52, 3 }
 0x14e   :  { %v1926_v17 = vadd.f32 %v1408_v63, %v435_v60  ;;  %v1955_v33 = vadd.f32 %v447_v19, %v443_v2  ;;  %vm186_vm1 = vcmp.eq.s32.totalorder %v40_v52, 4 }
 0x150   :  { %v1410_v0 = vpop.eup %1409  ;;  %1417 = vrcp.f32 %v1926_v17  ;;  %v464_v11 = vand.u32 2147483648, %v1926_v17  ;;  %vm458_vm4 = vweird.f32 %v1926_v17  ;;  %v462_v36 = vand.u32 2147483647, %v1926_v17 }
 0x151   :  { %v1412_v3 = vpop.eup %1411  ;;  %v440_v10 = vmul.f32 %v1410_v0, %v1640_v12  ;;  %v1953_v12 = vmul.f32 %v1408_v63, %v1725_v58  ;;  %v279_v58 = vld [vmem:[%s2363_s8] sm:$0xff] }
 0x152   :  { %v434_v51 = vadd.f32 %v1412_v3, %v1410_v0  ;;  %v1414_v5 = vpop.eup %1413  ;;  %v442_v25 = vmul.f32 %v1412_v3, %v1675_v39  ;;  %v684_v39 = vpop.xlane.xlu2 %683  ;;  %v465_v26 = vor.u32 1.1754944e-38, %v464_v11  ;;  %v1971_v47 = vpack.c.bf16 %v280_v23, %v279_v58 }
 0x153   :  { %v1416_v9 = vpop.eup %1415  ;;  %v444_v48 = vmul.f32 %v1414_v5, %v1706_v49  ;;  %vm1982_vm8 = vcmp.eq.f32.partialorder %v462_v36, 8.507059e+37  ;;  %v146_v0 = vpop.f32.mrf.mxu1  ;;  %v170_v3 = vsel %vm154_vm9, %v1929_v1, %v162_v54  ;;  %v451_v36 = vadd.f32 %v1955_v33, %v1953_v12 }
 0x154   :  { %v436_v50 = vadd.f32 %v1414_v5, %v434_v51  ;;  %v448_v28 = vadd.f32 %v442_v25, %v440_v10  ;;  %v446_v24 = vmul.f32 %v1416_v9, %v1730_v59  ;;  %v169_v59 = vsel %vm153_vm6, %v1912_v44, %v161_v46  ;;  %512 = vmatpush.bf16.msrb.mxu3 %v1971_v47 }
 0x155   :  { %v176_v60 = vsel %vm174_vm7, %v169_v59, -9e+15  ;;  %vm156_vm14 = vcmp.gt.f32.partialorder %v146_v0, 0.0 }
 0x156   :  { %v1933_v14 = vpop.eup %1417  ;;  %v1935_v18 = vadd.f32 %v1416_v9, %v436_v50  ;;  %v450_v32 = vadd.f32 %v448_v28, %v444_v48  ;;  %v180_v5 = vsel %vm178_vm10, %v170_v3, %v176_v60  ;;  %v164_v9 = vmul.f32 0.2, %v146_v0 }
 0x157   :  { %v454_v20 = vmul.f32 %v1933_v14, %v1926_v17  ;;  %vm459_vm5 = vweird.f32 %v1933_v14 }
 0x158   :  { %1419 = vrcp.f32 %v1935_v18  ;;  %v477_v55 = vand.u32 2147483647, %v1935_v18  ;;  %vm1993_vm11 = vmor %vm458_vm4, %vm459_vm5  ;;  %v479_v13 = vand.u32 2147483648, %v1935_v18  ;;  %v172_v25 = vsel %vm156_vm14, %v146_v0, %v164_v9 }
 0x159   :  { %v455_v29 = vsub.f32 1.0, %v454_v20  ;;  %v171_v20 = vsel %vm155_vm12, %v144_v27, %v163_v6  ;;  %vm473_vm2 = vweird.f32 %v1935_v18 }
 0x15a   :  { %v480_v38 = vor.u32 1.1754944e-38, %v479_v13  ;;  %vm478_vm5 = vcmp.eq.f32.partialorder %v477_v55, 8.507059e+37 }
 0x15b   :  { %v456_v34 = vmul.f32 %v1933_v14, %v455_v29 }
 0x15d   :  { %v708_v31 = vpop.xlane.xlu1 %707  ;;  %v457_v53 = vadd.f32 %v1933_v14, %v456_v34 }
 0x15e   :  { %v730_v37 = vmax.f32 %v684_v39, %v708_v31  ;;  %v1973_v7 = vpop.eup %1419 }
 0x15f   :  { %v469_v63 = vmul.f32 %v1973_v7, %v1935_v18  ;;  %v461_v51 = vsel %vm1993_vm11, %v1933_v14, %v457_v53  ;;  %vm474_vm13 = vweird.f32 %v1973_v7  ;;  %v184_v14 = vsel %vm182_vm15, %v171_v20, %v180_v5 }
 0x160   :  { %v738_v49 = vsub.f32 %v684_v39, %v730_v37  ;;  %v746_v8 = vsub.f32 %v708_v31, %v730_v37  ;;  %v2008_v45 = vsel %vm186_vm1, %v172_v25, %v184_v14  ;;  %v466_v31 = vsel %vm1982_vm8, %v465_v26, %v461_v51  ;;  %vm475_vm4 = vmor %vm473_vm2, %vm474_vm13  ;;  %v690_v26 = vpop.xlane.xlu0 %689 }
 0x161   :  { %v470_v62 = vsub.f32 1.0, %v469_v63  ;;  %v193_v27 = vsel %vm189_vm3, %v2008_v45, -inf  ;;  %v452_v18 = vadd.f32 %v450_v32, %v446_v24  ;;  %v467_v23 = vmul.f32 %v466_v31, %v451_v36 }
 0x162   :  { %v754_v56 = vmul.f32 1.442695, %v738_v49  ;;  %v770_v57 = vmul.f32 1.442695, %v746_v8  ;;  %194 = vmax.xlane.f32.xlu0 %v193_v27 }
 0x163   :  { %v471_v19 = vmul.f32 %v1973_v7, %v470_v62 }
 0x164   :  { %1421 = vpow2.f32 %v754_v56 }
 0x165   :  { %1423 = vpow2.f32 %v770_v57  ;;  %v711_v17 = vpop.xlane.xlu2 %710  ;;  %v472_v11 = vadd.f32 %v1973_v7, %v471_v19 }
 0x166   :  { %v731_v50 = vmax.f32 %v687_v61, %v711_v17 }
 0x167   :  { %v476_v37 = vsel %vm475_vm4, %v1973_v7, %v472_v11  ;;  %v693_v7 = vpop.xlane.xlu1 %692 }
 0x168   :  { %v739_v1 = vsub.f32 %v687_v61, %v731_v50  ;;  %v747_v10 = vsub.f32 %v711_v17, %v731_v50  ;;  %v481_v28 = vsel %vm478_vm5, %v480_v38, %v476_v37  ;;  %v1497_v17 = vld [vmem:[%s2355_s0] sm:$0xff] }
 0x169   :  { %v482_v46 = vmul.f32 %v481_v28, %v452_v18 }
 0x16a   :  { %v1422_v2 = vpop.eup %1421  ;;  %v756_v29 = vmul.f32 1.442695, %v739_v1  ;;  %v772_v39 = vmul.f32 1.442695, %v747_v10 }
 0x16b   :  { %v1424_v34 = vpop.eup %1423  ;;  %v484_v8 = vpack.c.bf16 %v482_v46, %v467_v23  ;;  %v794_v3 = vmul.f32 %v1422_v2, %v1686_v42 }
 0x16c   :  { %v2019_v48 = vadd.f32 %v1424_v34, %v1422_v2  ;;  %1425 = vpow2.f32 %v756_v29  ;;  %v802_v62 = vmul.f32 %v1424_v34, %v1759_v15 }
 0x16d   :  { %1427 = vpow2.f32 %v772_v39  ;;  %v714_v58 = vpop.xlane.xlu2 %713  ;;  %1354 = vmatmul.msk.bf16.vlgmr.msra.gmra.mxu3 %vm82_vm0, %v484_v8 }
 0x16e   :  { %1429 = vrcp.f32 %v2019_v48  ;;  %v732_v49 = vmax.f32 %v690_v26, %v714_v58  ;;  %1005 = vmatpush.bf16.msra.mxu3 %v1950_v30  ;;  %vm823_vm7 = vweird.f32 %v2019_v48  ;;  %v827_v42 = vand.u32 2147483647, %v2019_v48 }
 0x16f   :  { %v696_v50 = vpop.xlane.xlu1 %695  ;;  %v829_v19 = vand.u32 2147483648, %v2019_v48  ;;  %v810_v37 = vadd.f32 %v802_v62, %v794_v3 }
 0x170   :  { %v740_v52 = vsub.f32 %v690_v26, %v732_v49  ;;  %v748_v12 = vsub.f32 %v714_v58, %v732_v49  ;;  %vm828_vm10 = vcmp.eq.f32.partialorder %v827_v42, 8.507059e+37 }
 0x171   :  { %v830_v31 = vor.u32 1.1754944e-38, %v829_v19 }
 0x172   :  { %v1426_v33 = vpop.eup %1425  ;;  %v758_v53 = vmul.f32 1.442695, %v740_v52  ;;  %v774_v59 = vmul.f32 1.442695, %v748_v12  ;;  %1006 = vmatpush.bf16.msra.mxu3 %v1971_v47  ;;  %v483_v47 = vpack.c.bf16 %v1830_v35, %v1497_v17  ;;  %v1500_v17 = vld [vmem:[%s2359_s4 + $0x10] sm:$0xff] }
 0x173   :  { %v1428_v24 = vpop.eup %1427  ;;  %v795_v15 = vmul.f32 %v1426_v33, %v1691_v43 }
 0x174   :  { %v1430_v54 = vpop.eup %1429  ;;  %v787_v41 = vadd.f32 %v1428_v24, %v1426_v33  ;;  %1431 = vpow2.f32 %v758_v53  ;;  %v803_v1 = vmul.f32 %v1428_v24, %v1764_v16 }
 0x175   :  { %v819_v55 = vmul.f32 %v1430_v54, %v2019_v48  ;;  %v717_v56 = vpop.xlane.xlu0 %716  ;;  %vm824_vm6 = vweird.f32 %v1430_v54  ;;  %v699_v16 = vpop.xlane.xlu2 %698 }
 0x176   :  { %1433 = vrcp.f32 %v787_v41  ;;  %v733_v60 = vmax.f32 %v693_v7, %v717_v56  ;;  %vm2043_vm8 = vmor %vm823_vm7, %vm824_vm6  ;;  %v842_v11 = vand.u32 2147483647, %v787_v41  ;;  %v844_v38 = vand.u32 2147483648, %v787_v41 }
 0x177   :  { %v820_v57 = vsub.f32 1.0, %v819_v55  ;;  %1435 = vpow2.f32 %v774_v59  ;;  %vm838_vm11 = vweird.f32 %v787_v41  ;;  %v811_v28 = vadd.f32 %v803_v1, %v795_v15  ;;  %v1502_v15 = vld [vmem:[%s2359_s4 + $0x58] sm:$0xff] }
 0x178   :  { %v741_v61 = vsub.f32 %v693_v7, %v733_v60  ;;  %v749_v44 = vsub.f32 %v717_v56, %v733_v60  ;;  %v845_v26 = vor.u32 1.1754944e-38, %v844_v38  ;;  %vm843_vm13 = vcmp.eq.f32.partialorder %v842_v11, 8.507059e+37 }
 0x179   :  { %v821_v32 = vmul.f32 %v1430_v54, %v820_v57 }
 0x17a   :  { %v2026_v30 = vpop.eup %1431  ;;  %v760_v63 = vmul.f32 1.442695, %v741_v61  ;;  %v776_v13 = vmul.f32 1.442695, %v749_v44  ;;  %v1499_v61 = vld [vmem:[%s2358_s3 + $0x8] sm:$0xff] }
 0x17b   :  { %v822_v51 = vadd.f32 %v1430_v54, %v821_v32  ;;  %v1498_v32 = vld [vmem:[%s2358_s3] sm:$0xff] }
 0x17c   :  { %v1434_v0 = vpop.eup %1433  ;;  %1437 = vpow2.f32 %v760_v63  ;;  %v938_v44 = vpack.c.bf16 %v1499_v61, %v1498_v32  ;;  %v1503_v32 = vld [vmem:[%s2358_s3 + $0x10] sm:$0xff]  ;;  %v1504_v61 = vld [vmem:[%s2358_s3 + $0x18] sm:$0xff] }
 0x17d   :  { %v2033_v5 = vpop.eup %1435  ;;  %v834_v6 = vmul.f32 %v1434_v0, %v787_v41  ;;  %v720_v9 = vpop.xlane.xlu0 %719  ;;  %1439 = vpow2.f32 %v776_v13  ;;  %v826_v14 = vsel %vm2043_vm8, %v1430_v54, %v822_v51  ;;  %vm839_vm9 = vweird.f32 %v1434_v0  ;;  %1355 = vmatmul.msk.bf16.vlgmr.msrb.gmra.mxu3 %vm82_vm0, %v483_v47 }
 0x17e   :  { %v2041_v20 = vadd.f32 %v2033_v5, %v2026_v30  ;;  %v734_v25 = vmax.f32 %v696_v50, %v720_v9  ;;  %v831_v48 = vsel %vm828_vm10, %v830_v31, %v826_v14  ;;  %vm840_vm12 = vmor %vm838_vm11, %vm839_vm9  ;;  %v804_v13 = vmul.f32 %v2033_v5, %v1774_v22 }
 0x17f   :  { %v835_v10 = vsub.f32 1.0, %v834_v6  ;;  %v832_v12 = vmul.f32 %v831_v48, %v810_v37  ;;  %v796_v47 = vmul.f32 %v1500_v17, %v2026_v30  ;;  %v1501_v30 = vld [vmem:[%s2359_s4 + $0x18] sm:$0xff] }
 0x180   :  { %1441 = vrcp.f32 %v2041_v20  ;;  %v742_v29 = vsub.f32 %v696_v50, %v734_v25  ;;  %v750_v39 = vsub.f32 %v720_v9, %v734_v25  ;;  %vm853_vm15 = vweird.f32 %v2041_v20 }
 0x181   :  { %v836_v2 = vmul.f32 %v1434_v0, %v835_v10  ;;  %v857_v5 = vand.u32 2147483647, %v2041_v20  ;;  %v859_v50 = vand.u32 2147483648, %v2041_v20  ;;  %v812_v31 = vadd.f32 %v804_v13, %v796_v47 }
 0x182   :  { %v1438_v43 = vpop.eup %1437  ;;  %v762_v34 = vmul.f32 1.442695, %v742_v29  ;;  %v778_v36 = vmul.f32 1.442695, %v750_v39 }
 0x183   :  { %v837_v27 = vadd.f32 %v1434_v0, %v836_v2  ;;  %v1440_v18 = vpop.eup %1439  ;;  %v797_v19 = vmul.f32 %v1501_v30, %v1438_v43  ;;  %vm858_vm4 = vcmp.eq.f32.partialorder %v857_v5, 8.507059e+37  ;;  %v1507_v5 = vld [vmem:[%s2359_s4 + $0x68] sm:$0xff] }
 0x184   :  { %v2054_v23 = vadd.f32 %v1440_v18, %v1438_v43  ;;  %1443 = vpow2.f32 %v762_v34  ;;  %v805_v1 = vmul.f32 %v1502_v15, %v1440_v18  ;;  %v860_v43 = vor.u32 1.1754944e-38, %v859_v50  ;;  %v1375_v15 = vld [vmem:[%s2361_s6 + $0x38] sm:$0xff] }
 0x185   :  { %v841_v58 = vsel %vm840_vm12, %v1434_v0, %v837_v27  ;;  %v723_v46 = vpop.xlane.xlu1 %722  ;;  %1445 = vpow2.f32 %v778_v36  ;;  %v702_v0 = vpop.xlane.xlu2 %701 }
 0x186   :  { %v2056_v49 = vpop.eup %1441  ;;  %v846_v8 = vsel %vm843_vm13, %v845_v26, %v841_v58  ;;  %v735_v52 = vmax.f32 %v699_v16, %v723_v46  ;;  %1447 = vrcp.f32 %v2054_v23  ;;  %v874_v25 = vand.u32 2147483648, %v2054_v23  ;;  %v705_v36 = vpop.xlane.xlu0 %704 }
 0x187   :  { %v847_v33 = vmul.f32 %v846_v8, %v811_v28  ;;  %v849_v24 = vmul.f32 %v2056_v49, %v2041_v20  ;;  %vm854_vm14 = vweird.f32 %v2056_v49  ;;  %v872_v20 = vand.u32 2147483647, %v2054_v23 }
 0x188   :  { %v743_v7 = vsub.f32 %v699_v16, %v735_v52  ;;  %v751_v53 = vsub.f32 %v723_v46, %v735_v52  ;;  %vm2097_vm1 = vmor %vm853_vm15, %vm854_vm14  ;;  %vm868_vm5 = vweird.f32 %v2054_v23  ;;  %v813_v37 = vadd.f32 %v805_v1, %v797_v19 }
 0x189   :  { %v942_v59 = vpack.c.bf16 %v847_v33, %v832_v12  ;;  %v850_v54 = vsub.f32 1.0, %v849_v24  ;;  %v875_v28 = vor.u32 1.1754944e-38, %v874_v25  ;;  %vm873_vm7 = vcmp.eq.f32.partialorder %v872_v20, 8.507059e+37 }
 0x18a   :  { %v764_v41 = vmul.f32 1.442695, %v743_v7  ;;  %v780_v55 = vmul.f32 1.442695, %v751_v53  ;;  %v2061_v56 = vpop.eup %1443 }
 0x18b   :  { %1364 = vmatmul.msk.bf16.vlgmr.msra.gmra.mxu1 %vm82_vm0, %v942_v59  ;;  %v851_v57 = vmul.f32 %v2056_v49, %v850_v54  ;;  %v2065_v60 = vpop.eup %1445 }
 0x18c   :  { %1449 = vpow2.f32 %v764_v41  ;;  %v1448_v63 = vpop.eup %1447  ;;  %v2077_v3 = vadd.f32 %v2065_v60, %v2061_v56 }
 0x18d   :  { %1451 = vpow2.f32 %v780_v55  ;;  %v726_v51 = vpop.xlane.xlu1 %725  ;;  %v852_v6 = vadd.f32 %v2056_v49, %v851_v57  ;;  %v864_v22 = vmul.f32 %v1448_v63, %v2054_v23  ;;  %1368 = vmatmul.msk.bf16.vlgmr.msra.gmra.mxu3 %vm82_vm0, %v938_v44  ;;  %vm869_vm2 = vweird.f32 %v1448_v63 }
 0x18e   :  { %v736_v62 = vmax.f32 %v702_v0, %v726_v51  ;;  %1453 = vrcp.f32 %v2077_v3  ;;  %vm870_vm6 = vmor %vm868_vm5, %vm869_vm2  ;;  %v939_v44 = vpack.c.bf16 %v1504_v61, %v1503_v32  ;;  %vm883_vm9 = vweird.f32 %v2077_v3 }
 0x18f   :  { %v865_v35 = vsub.f32 1.0, %v864_v22  ;;  %v856_v2 = vsel %vm2097_vm1, %v2056_v49, %v852_v6  ;;  %v887_v47 = vand.u32 2147483647, %v2077_v3  ;;  %v1506_v6 = vld [vmem:[%s2359_s4 + $0x60] sm:$0xff] }
 0x190   :  { %v744_v9 = vsub.f32 %v702_v0, %v736_v62  ;;  %v752_v42 = vsub.f32 %v726_v51, %v736_v62  ;;  %v861_v48 = vsel %vm858_vm4, %v860_v43, %v856_v2  ;;  %v889_v0 = vand.u32 2147483648, %v2077_v3  ;;  %v1505_v51 = vld [vmem:[%s2359_s4 + $0x20] sm:$0xff] }
 0x191   :  { %v866_v29 = vmul.f32 %v1448_v63, %v865_v35  ;;  %v862_v52 = vmul.f32 %v861_v48, %v812_v31  ;;  %v798_v17 = vmul.f32 %v1505_v51, %v2061_v56  ;;  %v806_v22 = vmul.f32 %v1506_v6, %v2065_v60  ;;  %v1508_v56 = vld [vmem:[%s2359_s4 + $0x28] sm:$0xff]  ;;  %v1374_v35 = vld [vmem:[%s2361_s6 + $0x30] sm:$0xff] }
 0x192   :  { %v1450_v14 = vpop.eup %1449  ;;  %v766_v11 = vmul.f32 1.442695, %v744_v9  ;;  %v782_v38 = vmul.f32 1.442695, %v752_v42  ;;  %v890_v10 = vor.u32 1.1754944e-38, %v889_v0  ;;  %v1042_v20 = vpack.c.bf16 %v1375_v15, %v1374_v35  ;;  %v1380_v35 = vld [vmem:[%s2363_s8 + $0x38] sm:$0xff] }
 0x193   :  { %v1452_v39 = vpop.eup %1451  ;;  %v867_v16 = vadd.f32 %v1448_v63, %v866_v29  ;;  %v799_v9 = vmul.f32 %v1508_v56, %v1450_v14  ;;  %vm888_vm12 = vcmp.eq.f32.partialorder %v887_v47, 8.507059e+37  ;;  %v814_v2 = vadd.f32 %v806_v22, %v798_v17  ;;  %v1515_v56 = vld [vmem:[%s2358_s3 + $0x30] sm:$0xff] }
 0x194   :  { %v2106_v27 = vadd.f32 %v1452_v39, %v1450_v14  ;;  %1455 = vpow2.f32 %v766_v11  ;;  %v2109_v34 = vpop.eup %1453  ;;  %v807_v50 = vmul.f32 %v1507_v5, %v1452_v39  ;;  %1089 = vmatpush.bf16.msrb.mxu2 %v1042_v20 }
 0x195   :  { %1457 = vpow2.f32 %v782_v38  ;;  %v729_v18 = vpop.xlane.xlu2 %728  ;;  %v871_v58 = vsel %vm870_vm6, %v1448_v63, %v867_v16  ;;  %v879_v49 = vmul.f32 %v2109_v34, %v2077_v3  ;;  %vm884_vm8 = vweird.f32 %v2109_v34 }
 0x196   :  { %1459 = vrcp.f32 %v2106_v27  ;;  %v737_v26 = vmax.f32 %v705_v36, %v729_v18  ;;  %v876_v46 = vsel %vm873_vm7, %v875_v28, %v871_v58  ;;  %vm2154_vm10 = vmor %vm883_vm9, %vm884_vm8  ;;  %v904_v42 = vand.u32 2147483648, %v2106_v27  ;;  %v1510_v58 = vld [vmem:[%s2358_s3 + $0x28] sm:$0xff] }
 0x197   :  { %v877_v12 = vmul.f32 %v876_v46, %v813_v37  ;;  %v880_v33 = vsub.f32 1.0, %v879_v49  ;;  %v902_v19 = vand.u32 2147483647, %v2106_v27  ;;  %vm898_vm13 = vweird.f32 %v2106_v27 }
 0x198   :  { %v745_v23 = vsub.f32 %v705_v36, %v737_v26  ;;  %v753_v8 = vsub.f32 %v729_v18, %v737_v26  ;;  %v905_v39 = vor.u32 1.1754944e-38, %v904_v42  ;;  %v815_v31 = vadd.f32 %v807_v50, %v799_v9  ;;  %v1509_v26 = vld [vmem:[%s2358_s3 + $0x20] sm:$0xff]  ;;  %v1516_v9 = vld [vmem:[%s2358_s3 + $0x38] sm:$0xff] }
 0x199   :  { %v943_v59 = vpack.c.bf16 %v877_v12, %v862_v52  ;;  %v881_v41 = vmul.f32 %v2109_v34, %v880_v33  ;;  %vm903_vm15 = vcmp.eq.f32.partialorder %v902_v19, 8.507059e+37  ;;  %v940_v46 = vpack.c.bf16 %v1510_v58, %v1509_v26  ;;  %v1511_v52 = vld [vmem:[%s2359_s4 + $0x30] sm:$0xff]  ;;  %v1372_v42 = vld [vmem:[%s2361_s6 + $0x20] sm:$0xff] }
 0x19a   :  { %v2115_v24 = vpop.eup %1455  ;;  %v768_v7 = vmul.f32 1.442695, %v745_v23  ;;  %v784_v53 = vmul.f32 1.442695, %v753_v8  ;;  %v941_v3 = vpack.c.bf16 %v1516_v9, %v1515_v56  ;;  %v1379_v19 = vld [vmem:[%s2363_s8 + $0x30] sm:$0xff] }
 0x19b   :  { %v2117_v54 = vpop.eup %1457  ;;  %1365 = vmatmul.msk.bf16.gmra.mxu1 %vm82_vm0, %v943_v59  ;;  %v882_v63 = vadd.f32 %v2109_v34, %v881_v41  ;;  %v800_v12 = vmul.f32 %v1511_v52, %v2115_v24  ;;  %v1513_v41 = vld [vmem:[%s2359_s4 + $0x78] sm:$0xff]  ;;  %v1051_v15 = vpack.c.bf16 %v1380_v35, %v1379_v19  ;;  %v1517_v58 = vld [vmem:[%s2360_s5] ss:$0 sm:$0xff] }
 0x19c   :  { %v1460_v55 = vpop.eup %1459  ;;  %v2122_v57 = vadd.f32 %v2117_v54, %v2115_v24  ;;  %1461 = vpow2.f32 %v768_v7  ;;  %v1514_v24 = vld [vmem:[%s2359_s4 + $0x38] sm:$0xff] }
 0x19d   :  { %1463 = vpow2.f32 %v784_v53  ;;  %v894_v13 = vmul.f32 %v1460_v55, %v2106_v27  ;;  %1369 = vmatmul.msk.bf16.gmra.mxu3 %vm82_vm0, %v939_v44  ;;  %v886_v60 = vsel %vm2154_vm10, %v2109_v34, %v882_v63  ;;  %vm899_vm11 = vweird.f32 %v1460_v55  ;;  %v1512_v53 = vld [vmem:[%s2359_s4 + $0x70] sm:$0xff] }
 0x19e   :  { %1465 = vrcp.f32 %v2122_v57  ;;  %v891_v29 = vsel %vm888_vm12, %v890_v10, %v886_v60  ;;  %vm900_vm14 = vmor %vm898_vm13, %vm899_vm11  ;;  %v919_v8 = vand.u32 2147483648, %v2122_v57  ;;  %vm913_vm2 = vweird.f32 %v2122_v57  ;;  %v1373_v60 = vld [vmem:[%s2361_s6 + $0x28] sm:$0xff]  ;;  %1279 = vmatpush.bf16.msrb.mxu3 %v1051_v15  ;;  %v2278_v15 = vld [vmem:[%s2362_s7 + $0x1] ss:$0 sm:$0xff] }
 0x19f   :  { %v895_v62 = vsub.f32 1.0, %v894_v13  ;;  %v892_v36 = vmul.f32 %v891_v29, %v814_v2  ;;  %v917_v33 = vand.u32 2147483647, %v2122_v57  ;;  %v808_v59 = vmul.f32 %v1512_v53, %v2117_v54  ;;  %v1378_v10 = vld [vmem:[%s2363_s8 + $0x28] sm:$0xff] }
 0x1a0   :  { %v920_v13 = vor.u32 1.1754944e-38, %v919_v8 }
 0x1a1   :  { %v896_v30 = vmul.f32 %v1460_v55, %v895_v62  ;;  %vm918_vm6 = vcmp.eq.f32.partialorder %v917_v33, 8.507059e+37  ;;  %v816_v17 = vadd.f32 %v808_v59, %v800_v12 }
 0x1a2   :  { %v1462_v1 = vpop.eup %1461 }
 0x1a3   :  { %v1464_v25 = vpop.eup %1463  ;;  %v897_v14 = vadd.f32 %v1460_v55, %v896_v30  ;;  %v801_v32 = vmul.f32 %v1514_v24, %v1462_v1  ;;  %v1041_v30 = vpack.c.bf16 %v1373_v60, %v1372_v42 }
 0x1a4   :  { %v1466_v11 = vpop.eup %1465  ;;  %v793_v38 = vadd.f32 %v1464_v25, %v1462_v1  ;;  %v1377_v1 = vld [vmem:[%s2363_s8 + $0x20] sm:$0xff] }
 0x1a5   :  { %v901_v43 = vsel %vm900_vm14, %v1460_v55, %v897_v14  ;;  %v909_v16 = vmul.f32 %v1466_v11, %v2122_v57  ;;  %vm914_vm1 = vweird.f32 %v1466_v11  ;;  %v809_v55 = vmul.f32 %v1513_v41, %v1464_v25  ;;  %1090 = vmatpush.bf16.msrb.mxu2 %v1041_v30 }
 0x1a6   :  { %1467 = vrcp.f32 %v793_v38  ;;  %v906_v34 = vsel %vm903_vm15, %v905_v39, %v901_v43  ;;  %vm915_vm4 = vmor %vm913_vm2, %vm914_vm1  ;;  %v934_v61 = vand.u32 2147483648, %v793_v38  ;;  %v932_v63 = vand.u32 2147483647, %v793_v38 }
 0x1a7   :  { %v907_v18 = vmul.f32 %v906_v34, %v815_v31  ;;  %v910_v37 = vsub.f32 1.0, %v909_v16  ;;  %vm928_vm7 = vweird.f32 %v793_v38  ;;  %v817_v47 = vadd.f32 %v809_v55, %v801_v32 }
 0x1a8   :  { %v935_v51 = vor.u32 1.1754944e-38, %v934_v61  ;;  %vm933_vm9 = vcmp.eq.f32.partialorder %v932_v63, 8.507059e+37  ;;  %v1050_v20 = vpack.c.bf16 %v1378_v10, %v1377_v1 }
 0x1a9   :  { %v944_v48 = vpack.c.bf16 %v907_v18, %v892_v36  ;;  %v911_v27 = vmul.f32 %v1466_v11, %v910_v37 }
 0x1aa   :  { %1280 = vmatpush.bf16.msrb.mxu3 %v1050_v20 }
 0x1ab   :  { %1366 = vmatmul.msk.bf16.gmra.mxu1 %vm82_vm0, %v944_v48  ;;  %v912_v49 = vadd.f32 %v1466_v11, %v911_v27 }
 0x1ac   :  { %v1468_v28 = vpop.eup %1467 }
 0x1ad   :  { %v924_v23 = vmul.f32 %v1468_v28, %v793_v38  ;;  %1370 = vmatmul.msk.bf16.gmra.mxu3 %vm82_vm0, %v940_v46  ;;  %v916_v57 = vsel %vm915_vm4, %v1466_v11, %v912_v49  ;;  %vm929_vm5 = vweird.f32 %v1468_v28  ;;  %v1518_v49 = vld [vmem:[%s2360_s5 + $0x1] ss:$0 sm:$0xff]  ;;  %vm1292_vm4 = vcmask 1043456  }
 0x1ae   :  { %v921_v0 = vsel %vm918_vm6, %v920_v13, %v916_v57  ;;  %vm930_vm8 = vmor %vm928_vm7, %vm929_vm5 }
 0x1af   :  { %v925_v7 = vsub.f32 1.0, %v924_v23  ;;  %v922_v22 = vmul.f32 %v921_v0, %v816_v17 }
 0x1b1   :  { %v926_v44 = vmul.f32 %v1468_v28, %v925_v7 }
 0x1b3   :  { %v927_v54 = vadd.f32 %v1468_v28, %v926_v44 }
 0x1b5   :  { %v931_v62 = vsel %vm930_vm8, %v1468_v28, %v927_v54 }
 0x1b6   :  { %v936_v6 = vsel %vm933_vm9, %v935_v51, %v931_v62 }
 0x1b7   :  { %v937_v5 = vmul.f32 %v936_v6, %v817_v47 }
 0x1b9   :  { %v945_v50 = vpack.c.bf16 %v937_v5, %v922_v22 }
 0x1bb   :  { %1367 = vmatmul.msk.bf16.gmra.mxu1 %vm82_vm0, %v945_v50 }
 0x1bd   :  { %1371 = vmatmul.msk.bf16.gmra.mxu3 %vm82_vm0, %v941_v3 }
 0x1f0   :  { %v497_v25 = vpop.f32.mrf.mxu3 }
 0x1f8   :  { %v499_v14 = vpop.f32.mrf.mxu3 }
 0x200   :  { %v514_v11 = vpop.f32.mrf.mxu3 }
 0x201   :  { %v515_v2 = vadd.f32 %v514_v11, %v497_v25 }
 0x203   :  { %v519_v31 = vmax.f32 %v515_v2, 0.0 }
 0x208   :  { %v967_v38 = vpop.f32.mrf.mxu1  ;;  %v516_v29 = vpop.f32.mrf.mxu3 }
 0x209   :  { %v517_v39 = vadd.f32 %v516_v29, %v499_v14 }
 0x20b   :  { %v520_v43 = vmax.f32 %v517_v39, 0.0 }
 0x20d   :  { %v1251_v34 = vpack.c.bf16 %v520_v43, %v519_v31 }
 0x20f   :  { %1390 = vmatmul.msk.bf16.vlgmr.msrb.gmra.mxu3 %vm82_vm0, %v1251_v34 }
 0x210   :  { %v969_v16 = vpop.f32.mrf.mxu1  ;;  %v1008_v36 = vpop.f32.mrf.mxu3 }
 0x211   :  { %v2225_v18 = vadd.f32 %v1008_v36, %v967_v38 }
 0x213   :  { %v1028_v27 = vmax.f32 %v2225_v18, 0.0 }
 0x215   :  { %v1059_v46 = vmul.f32 %v1517_v58, %v1028_v27 }
 0x218   :  { %v972_v37 = vpop.f32.mrf.mxu1  ;;  %v1010_v48 = vpop.f32.mrf.mxu3 }
 0x219   :  { %v2228_v28 = vadd.f32 %v1010_v48, %v969_v16 }
 0x21b   :  { %v1029_v26 = vmax.f32 %v2228_v28, 0.0 }
 0x21d   :  { %v1060_v23 = vmul.f32 %v1518_v49, %v1029_v26 }
 0x21f   :  { %v1067_v8 = vpack.c.bf16 %v1060_v23, %v1059_v46 }
 0x220   :  { %v974_v52 = vpop.f32.mrf.mxu1  ;;  %v1013_v12 = vpop.f32.mrf.mxu3 }
 0x221   :  { %1385 = vmatmul.msk.bf16.vlgmr.msrb.gmra.mxu2 %vm82_vm0, %v1067_v8  ;;  %v2242_v33 = vadd.f32 %v1013_v12, %v972_v37  ;;  %v195_v8 = vpop.xlane.xlu0 %194 }
 0x223   :  { %v1030_v53 = vmax.f32 %v2242_v33, 0.0 }
 0x225   :  { %v1061_v24 = vmul.f32 %v1517_v58, %v1030_v53 }
 0x228   :  { %v1015_v7 = vpop.f32.mrf.mxu3  ;;  %v977_v41 = vpop.f32.mrf.mxu1 }
 0x229   :  { %v2245_v59 = vadd.f32 %v1015_v7, %v974_v52  ;;  %v197_v7 = vsub.f32 %v2008_v45, %v195_v8 }
 0x22b   :  { %v1031_v55 = vmax.f32 %v2245_v59, 0.0 }
 0x22d   :  { %v1062_v32 = vmul.f32 %v1518_v49, %v1031_v55 }
 0x22f   :  { %v1068_v61 = vpack.c.bf16 %v1062_v32, %v1061_v24  ;;  %v200_v32 = vmul.f32 1.442695, %v197_v7 }
 0x230   :  { %v1018_v57 = vpop.f32.mrf.mxu3  ;;  %v979_v44 = vpop.f32.mrf.mxu1 }
 0x231   :  { %1386 = vmatmul.msk.bf16.gmra.mxu2 %vm82_vm0, %v1068_v61  ;;  %v2253_v63 = vadd.f32 %v1018_v57, %v977_v41  ;;  %v192_v57 = vpop.xlane.xlu1 %191  ;;  %1469 = vpow2.f32 %v200_v32 }
 0x233   :  { %v1032_v54 = vmax.f32 %v2253_v63, 0.0 }
 0x235   :  { %v1063_v17 = vmul.f32 %v1517_v58, %v1032_v54 }
 0x238   :  { %v1020_v13 = vpop.f32.mrf.mxu3  ;;  %v982_v62 = vpop.f32.mrf.mxu1 }
 0x239   :  { %v2256_v0 = vadd.f32 %v1020_v13, %v979_v44 }
 0x23b   :  { %v1033_v51 = vmax.f32 %v2256_v0, 0.0 }
 0x23d   :  { %v1064_v47 = vmul.f32 %v1518_v49, %v1033_v51 }
 0x23f   :  { %v1069_v6 = vpack.c.bf16 %v1064_v47, %v1063_v17  ;;  %v196_v17 = vsub.f32 %v1906_v21, %v192_v57 }
 0x240   :  { %v1023_v22 = vpop.f32.mrf.mxu3  ;;  %v984_v50 = vpop.f32.mrf.mxu1 }
 0x241   :  { %1387 = vmatmul.msk.bf16.gmra.mxu2 %vm82_vm0, %v1069_v6  ;;  %v2264_v5 = vadd.f32 %v1023_v22, %v982_v62  ;;  %v198_v6 = vmul.f32 1.442695, %v196_v17  ;;  %v2294_v22 = vpop.eup %1469 }
 0x243   :  { %v1034_v9 = vmax.f32 %v2264_v5, 0.0  ;;  %1471 = vpow2.f32 %v198_v6 }
 0x245   :  { %v1065_v60 = vmul.f32 %v1517_v58, %v1034_v9 }
 0x248   :  { %v1025_v56 = vpop.f32.mrf.mxu3 }
 0x249   :  { %v2267_v3 = vadd.f32 %v1025_v56, %v984_v50 }
 0x24b   :  { %v1035_v42 = vmax.f32 %v2267_v3, 0.0 }
 0x24d   :  { %v1066_v30 = vmul.f32 %v1518_v49, %v1035_v42 }
 0x24f   :  { %v1070_v19 = vpack.c.bf16 %v1066_v30, %v1065_v60  ;;  %v205_v30 = vsel %vm189_vm3, %v2294_v22, 0.0 }
 0x251   :  { %1388 = vmatmul.msk.bf16.gmra.mxu2 %vm82_vm0, %v1070_v19 }
 0x2a4   :  { %v1092_v35 = vpop.f32.mrf.mxu2 }
 0x2a5   :  { %vm1112_vm10 = vcmp.gt.f32.partialorder %v1092_v35, 0.0  ;;  %v1120_v1 = vmul.f32 0.2, %v1092_v35 }
 0x2a7   :  { %v1128_v10 = vsel %vm1112_vm10, %v1092_v35, %v1120_v1  ;;  %v2300_v35 = vpop.eup %1471 }
 0x2a8   :  { %v1139_v20 = vmul.f32 %v2278_v15, %v1128_v10 }
 0x2aa   :  { %v1147_v25 = vsel %vm82_vm0, %v1139_v20, 0.0 }
 0x2ab   :  { %1148 = vadd.xlane.f32.xlu2 %v1147_v25  ;;  %v202_v25 = vsel %vm189_vm3, %v2300_v35, 0.0 }
 0x2ac   :  { %v1094_v14 = vpop.f32.mrf.mxu2 }
 0x2ad   :  { %vm1113_vm11 = vcmp.gt.f32.partialorder %v1094_v14, 0.0  ;;  %v1121_v11 = vmul.f32 0.2, %v1094_v14 }
 0x2af   :  { %v1129_v38 = vsel %vm1113_vm11, %v1094_v14, %v1121_v11  ;;  %v1383_v14 = vld [vmem:[%s2364_s9 + $0x30] sm:$0xff]  ;;  %v1384_v11 = vld [vmem:[%s2364_s9 + $0x38] sm:$0xff] }
 0x2b0   :  { %v1140_v2 = vmul.f32 %v2278_v15, %v1129_v38  ;;  %v1058_v38 = vpack.c.bf16 %v1384_v11, %v1383_v14 }
 0x2b2   :  { %v1150_v29 = vsel %vm82_vm0, %v1140_v2, 0.0  ;;  %1262 = vmatpush.bf16.msrb.mxu1 %v1058_v38 }
 0x2b3   :  { %1151 = vadd.xlane.f32.xlu0 %v1150_v29 }
 0x2b4   :  { %v1097_v39 = vpop.f32.mrf.mxu2 }
 0x2b5   :  { %vm1114_vm12 = vcmp.gt.f32.partialorder %v1097_v39, 0.0  ;;  %v1122_v31 = vmul.f32 0.2, %v1097_v39 }
 0x2b7   :  { %v1130_v43 = vsel %vm1114_vm12, %v1097_v39, %v1122_v31  ;;  %v1311_v39 = vsel %vm1292_vm4, %v1834_v40, 0 }
 0x2b8   :  { %v1141_v16 = vmul.f32 %v2278_v15, %v1130_v43  ;;  %1320 = vmatpush.bf16.msra.mxu3 %v1311_v39 }
 0x2ba   :  { %v1153_v34 = vsel %vm82_vm0, %v1141_v16, 0.0 }
 0x2bb   :  { %1154 = vadd.xlane.f32.xlu1 %v1153_v34 }
 0x2bc   :  { %v1099_v36 = vpop.f32.mrf.mxu2 }
 0x2bd   :  { %vm1115_vm13 = vcmp.gt.f32.partialorder %v1099_v36, 0.0  ;;  %v1123_v37 = vmul.f32 0.2, %v1099_v36 }
 0x2bf   :  { %v1131_v48 = vsel %vm1115_vm13, %v1099_v36, %v1123_v37 }
 0x2c0   :  { %v1142_v58 = vmul.f32 %v2278_v15, %v1131_v48 }
 0x2c2   :  { %v1156_v46 = vsel %vm82_vm0, %v1142_v58, 0.0 }
 0x2c3   :  { %1157 = vadd.xlane.f32.xlu2 %v1156_v46 }
 0x2c4   :  { %v1102_v49 = vpop.f32.mrf.mxu2 }
 0x2c5   :  { %vm1116_vm14 = vcmp.gt.f32.partialorder %v1102_v49, 0.0  ;;  %v1124_v23 = vmul.f32 0.2, %v1102_v49 }
 0x2c7   :  { %v1132_v52 = vsel %vm1116_vm14, %v1102_v49, %v1124_v23 }
 0x2c8   :  { %v1143_v12 = vmul.f32 %v2278_v15, %v1132_v52 }
 0x2ca   :  { %v1159_v41 = vsel %vm82_vm0, %v1143_v12, 0.0 }
 0x2cb   :  { %1160 = vadd.xlane.f32.xlu0 %v1159_v41 }
 0x2cc   :  { %v1104_v24 = vpop.f32.mrf.mxu2 }
 0x2cd   :  { %vm1117_vm15 = vcmp.gt.f32.partialorder %v1104_v24, 0.0  ;;  %v1125_v61 = vmul.f32 0.2, %v1104_v24 }
 0x2cf   :  { %v1133_v44 = vsel %vm1117_vm15, %v1104_v24, %v1125_v61 }
 0x2d0   :  { %v1144_v13 = vmul.f32 %v2278_v15, %v1133_v44 }
 0x2d2   :  { %v1162_v47 = vsel %vm82_vm0, %v1144_v13, 0.0 }
 0x2d3   :  { %1163 = vadd.xlane.f32.xlu1 %v1162_v47 }
 0x2d4   :  { %v1107_v62 = vpop.f32.mrf.mxu2 }
 0x2d5   :  { %vm1118_vm1 = vcmp.gt.f32.partialorder %v1107_v62, 0.0  ;;  %v1126_v45 = vmul.f32 0.2, %v1107_v62 }
 0x2d7   :  { %v1134_v50 = vsel %vm1118_vm1, %v1107_v62, %v1126_v45 }
 0x2d8   :  { %v1145_v56 = vmul.f32 %v2278_v15, %v1134_v50 }
 0x2da   :  { %v1165_v60 = vsel %vm82_vm0, %v1145_v56, 0.0 }
 0x2db   :  { %1166 = vadd.xlane.f32.xlu2 %v1165_v60  ;;  %206 = vadd.xlane.f32.xlu1 %v205_v30 }
 0x2dc   :  { %v1109_v21 = vpop.f32.mrf.mxu2 }
 0x2dd   :  { %vm1119_vm2 = vcmp.gt.f32.partialorder %v1109_v21, 0.0  ;;  %v1127_v19 = vmul.f32 0.2, %v1109_v21 }
 0x2df   :  { %v1135_v1 = vsel %vm1119_vm2, %v1109_v21, %v1127_v19 }
 0x2e0   :  { %v1146_v10 = vmul.f32 %v2278_v15, %v1135_v1 }
 0x2e2   :  { %v1168_v20 = vsel %vm82_vm0, %v1146_v10, 0.0 }
 0x2e3   :  { %1169 = vadd.xlane.f32.xlu0 %v1168_v20  ;;  %203 = vadd.xlane.f32.xlu2 %v202_v25  ;;  %v1381_v20 = vld [vmem:[%s2364_s9 + $0x20] sm:$0xff]  ;;  %v1382_v25 = vld [vmem:[%s2364_s9 + $0x28] sm:$0xff]  ;;  %s1545_s9 = smov [#allocation2]  }
 0x2e4   :  { %v1057_v38 = vpack.c.bf16 %v1382_v25, %v1381_v20  ;;  %s1332_s12 = sshll.u32 %s1545_s9, 4  ;;  %s1333_s12 = int_to_ptr.vmem [resolvable:$true] %s1332_s12 }
 0x2e6   :  { %1263 = vmatpush.bf16.msrb.mxu1 %v1057_v38 }
 0x31e   :  { %v1149_v2 = vpop.xlane.xlu2 %1148 }
 0x326   :  { %v1152_v15 = vpop.xlane.xlu0 %1151 }
 0x32e   :  { %v1155_v29 = vpop.xlane.xlu1 %1154 }
 0x32f   :  { %v1171_v34 = vmax.f32 %v1149_v2, %v1155_v29 }
 0x336   :  { %v1158_v31 = vpop.xlane.xlu2 %1157 }
 0x337   :  { %v1172_v52 = vmax.f32 %v1152_v15, %v1158_v31 }
 0x33e   :  { %v1161_v16 = vpop.xlane.xlu0 %1160 }
 0x33f   :  { %v1173_v36 = vmax.f32 %v1171_v34, %v1161_v16  ;;  %v1293_v34 = vsel %vm1292_vm4, %v1612_v4, 0 }
 0x340   :  { %1302 = vmatpush.bf16.msra.mxu1 %v1293_v34 }
 0x346   :  { %v1164_v43 = vpop.xlane.xlu1 %1163 }
 0x347   :  { %v1174_v40 = vmax.f32 %v1172_v52, %v1164_v43 }
 0x34e   :  { %v1167_v37 = vpop.xlane.xlu2 %1166  ;;  %v207_v48 = vpop.xlane.xlu1 %206 }
 0x34f   :  { %v1175_v58 = vmax.f32 %v1173_v36, %v1167_v37  ;;  %1473 = vrcp.f32 %v207_v48  ;;  %v232_v17 = vand.u32 2147483647, %v207_v48  ;;  %v234_v47 = vand.u32 2147483648, %v207_v48 }
 0x350   :  { %vm228_vm6 = vweird.f32 %v207_v48 }
 0x351   :  { %v1177_v46 = vsub.f32 %v1149_v2, %v1175_v58  ;;  %v1179_v49 = vsub.f32 %v1155_v29, %v1175_v58  ;;  %v1181_v23 = vsub.f32 %v1161_v16, %v1175_v58  ;;  %v1183_v8 = vsub.f32 %v1167_v37, %v1175_v58 }
 0x352   :  { %v235_v11 = vor.u32 1.1754944e-38, %v234_v47  ;;  %vm233_vm8 = vcmp.eq.f32.partialorder %v232_v17, 8.507059e+37 }
 0x353   :  { %v1185_v12 = vmul.f32 1.442695, %v1177_v46  ;;  %v1189_v7 = vmul.f32 1.442695, %v1179_v49  ;;  %v1193_v41 = vmul.f32 1.442695, %v1181_v23 }
 0x354   :  { %v1197_v32 = vmul.f32 1.442695, %v1183_v8 }
 0x355   :  { %v1474_v24 = vpop.eup %1473  ;;  %1475 = vpow2.f32 %v1185_v12 }
 0x356   :  { %1477 = vpow2.f32 %v1189_v7  ;;  %v224_v61 = vmul.f32 %v1474_v24, %v207_v48  ;;  %v1170_v57 = vpop.xlane.xlu0 %1169  ;;  %vm229_vm5 = vweird.f32 %v1474_v24  ;;  %v2324_v8 = vpop.xlane.xlu2 %203 }
 0x357   :  { %v1176_v44 = vmax.f32 %v1174_v40, %v1170_v57  ;;  %1479 = vpow2.f32 %v1193_v41  ;;  %vm230_vm7 = vmor %vm228_vm6, %vm229_vm5  ;;  %v219_v3 = vand.u32 2147483648, %v2324_v8  ;;  %vm213_vm4 = vweird.f32 %v2324_v8 }
 0x358   :  { %v225_v13 = vsub.f32 1.0, %v224_v61  ;;  %1481 = vpow2.f32 %v1197_v32 }
 0x359   :  { %v1178_v62 = vsub.f32 %v1152_v15, %v1176_v44  ;;  %v1180_v6 = vsub.f32 %v1158_v31, %v1176_v44  ;;  %v1182_v45 = vsub.f32 %v1164_v43, %v1176_v44  ;;  %v1184_v56 = vsub.f32 %v1170_v57, %v1176_v44 }
 0x35a   :  { %v226_v50 = vmul.f32 %v1474_v24, %v225_v13 }
 0x35b   :  { %v1476_v60 = vpop.eup %1475  ;;  %v1187_v30 = vmul.f32 1.442695, %v1178_v62  ;;  %v1191_v21 = vmul.f32 1.442695, %v1180_v6  ;;  %v1195_v10 = vmul.f32 1.442695, %v1182_v45 }
 0x35c   :  { %v1478_v19 = vpop.eup %1477  ;;  %v227_v1 = vadd.f32 %v1474_v24, %v226_v50  ;;  %v1199_v15 = vmul.f32 1.442695, %v1184_v56  ;;  %v1207_v41 = vmul.f32 %v1476_v60, %v1028_v27 }
 0x35d   :  { %v1201_v14 = vadd.f32 %v1478_v19, %v1476_v60  ;;  %1483 = vpow2.f32 %v1187_v30  ;;  %v1480_v2 = vpop.eup %1479 }
 0x35e   :  { %v231_v29 = vsel %vm230_vm7, %v1474_v24, %v227_v1  ;;  %1485 = vpow2.f32 %v1191_v21  ;;  %v1482_v43 = vpop.eup %1481  ;;  %v1209_v24 = vmul.f32 %v1478_v19, %v1030_v53  ;;  %v1211_v18 = vmul.f32 %v1480_v2, %v1032_v54 }
 0x35f   :  { %v1203_v39 = vadd.f32 %v1480_v2, %v1201_v14  ;;  %v236_v31 = vsel %vm233_vm8, %v235_v11, %v231_v29  ;;  %1487 = vpow2.f32 %v1195_v10  ;;  %v1213_v63 = vmul.f32 %v1482_v43, %v1034_v9 }
 0x360   :  { %v237_v16 = vmul.f32 %v2294_v22, %v236_v31  ;;  %1489 = vpow2.f32 %v1199_v15  ;;  %v1215_v13 = vadd.f32 %v1209_v24, %v1207_v41  ;;  %v220_v2 = vor.u32 1.1754944e-38, %v219_v3  ;;  %v1282_v31 = vpop.f32.mrf.mxu3 }
 0x361   :  { %v1205_v36 = vadd.f32 %v1482_v43, %v1203_v39 }
 0x362   :  { %v239_v37 = vpack.c.bf16 %v237_v16, %v237_v16  ;;  %v1217_v59 = vadd.f32 %v1215_v13, %v1211_v18 }
 0x363   :  { %v1484_v48 = vpop.eup %1483  ;;  %1491 = vrcp.f32 %v1205_v36  ;;  %v1232_v27 = vand.u32 2147483648, %v1205_v36  ;;  %vm1226_vm10 = vweird.f32 %v1205_v36 }
 0x364   :  { %v1486_v58 = vpop.eup %1485  ;;  %1392 = vmatmul.msk.bf16.vlgmr.msra.gmra.mxu3 %vm189_vm3, %v239_v37  ;;  %1493 = vrcp.f32 %v2324_v8  ;;  %v1208_v40 = vmul.f32 %v1484_v48, %v1029_v26  ;;  %v1230_v26 = vand.u32 2147483647, %v1205_v36  ;;  %v1219_v19 = vadd.f32 %v1217_v59, %v1213_v63 }
 0x365   :  { %v1202_v46 = vadd.f32 %v1486_v58, %v1484_v48  ;;  %v1488_v49 = vpop.eup %1487  ;;  %v1210_v32 = vmul.f32 %v1486_v58, %v1031_v55  ;;  %v1233_v54 = vor.u32 1.1754944e-38, %v1232_v27 }
 0x366   :  { %v1490_v52 = vpop.eup %1489  ;;  %v1212_v33 = vmul.f32 %v1488_v49, %v1033_v51  ;;  %vm1231_vm13 = vcmp.eq.f32.partialorder %v1230_v26, 8.507059e+37 }
 0x367   :  { %v1204_v23 = vadd.f32 %v1488_v49, %v1202_v46  ;;  %v1216_v17 = vadd.f32 %v1210_v32, %v1208_v40  ;;  %v1214_v0 = vmul.f32 %v1490_v52, %v1035_v42  ;;  %v217_v42 = vand.u32 2147483647, %v2324_v8 }
 0x368   :  { %v1284_v43 = vpop.f32.mrf.mxu3 }
 0x369   :  { %v1492_v22 = vpop.eup %1491  ;;  %v1206_v12 = vadd.f32 %v1490_v52, %v1204_v23  ;;  %v1218_v55 = vadd.f32 %v1216_v17, %v1212_v33  ;;  %vm218_vm6 = vcmp.eq.f32.partialorder %v217_v42, 8.507059e+37 }
 0x36a   :  { %v1222_v7 = vmul.f32 %v1492_v22, %v1205_v36  ;;  %v1494_v57 = vpop.eup %1493  ;;  %vm1227_vm9 = vweird.f32 %v1492_v22 }
 0x36b   :  { %1495 = vrcp.f32 %v1206_v12  ;;  %v209_v28 = vmul.f32 %v1494_v57, %v2324_v8  ;;  %vm1228_vm11 = vmor %vm1226_vm10, %vm1227_vm9  ;;  %v1247_v6 = vand.u32 2147483648, %v1206_v12  ;;  %v1245_v56 = vand.u32 2147483647, %v1206_v12 }
 0x36c   :  { %v1223_v4 = vsub.f32 1.0, %v1222_v7  ;;  %vm1241_vm14 = vweird.f32 %v1206_v12  ;;  %v1220_v1 = vadd.f32 %v1218_v55, %v1214_v0  ;;  %vm214_vm2 = vweird.f32 %v1494_v57 }
 0x36d   :  { %v210_v60 = vsub.f32 1.0, %v209_v28  ;;  %v1248_v21 = vor.u32 1.1754944e-38, %v1247_v6  ;;  %vm1246_vm1 = vcmp.eq.f32.partialorder %v1245_v56, 8.507059e+37  ;;  %vm215_vm5 = vmor %vm213_vm4, %vm214_vm2 }
 0x36e   :  { %v1224_v61 = vmul.f32 %v1492_v22, %v1223_v4 }
 0x36f   :  { %v211_v5 = vmul.f32 %v1494_v57, %v210_v60 }
 0x370   :  { %v1225_v47 = vadd.f32 %v1492_v22, %v1224_v61 }
 0x371   :  { %v1496_v44 = vpop.eup %1495  ;;  %v212_v11 = vadd.f32 %v1494_v57, %v211_v5 }
 0x372   :  { %v1237_v62 = vmul.f32 %v1496_v44, %v1206_v12  ;;  %v1229_v45 = vsel %vm1228_vm11, %v1492_v22, %v1225_v47  ;;  %vm1242_vm12 = vweird.f32 %v1496_v44 }
 0x373   :  { %v1234_v30 = vsel %vm1231_vm13, %v1233_v54, %v1229_v45  ;;  %vm1243_vm15 = vmor %vm1241_vm14, %vm1242_vm12  ;;  %v216_v38 = vsel %vm215_vm5, %v1494_v57, %v212_v11 }
 0x374   :  { %v1238_v53 = vsub.f32 1.0, %v1237_v62  ;;  %v1235_v25 = vmul.f32 %v1234_v30, %v1219_v19  ;;  %v221_v29 = vsel %vm218_vm6, %v220_v2, %v216_v38 }
 0x375   :  { %v222_v15 = vmul.f32 %v2300_v35, %v221_v29 }
 0x376   :  { %v1239_v50 = vmul.f32 %v1496_v44, %v1238_v53 }
 0x377   :  { %v238_v39 = vpack.c.bf16 %v222_v15, %v222_v15 }
 0x378   :  { %v1240_v51 = vadd.f32 %v1496_v44, %v1239_v50 }
 0x37a   :  { %v1244_v10 = vsel %vm1243_vm15, %v1496_v44, %v1240_v51 }
 0x37b   :  { %v1249_v20 = vsel %vm1246_vm1, %v1248_v21, %v1244_v10 }
 0x37c   :  { %v1250_v14 = vmul.f32 %v1249_v20, %v1220_v1 }
 0x37e   :  { %v1252_v9 = vpack.c.bf16 %v1250_v14, %v1235_v25 }
 0x380   :  { %1389 = vmatmul.msk.bf16.vlgmr.msrb.gmra.mxu1 %vm82_vm0, %v1252_v9 }
 0x390   :  { %1391 = vmatmul.msk.bf16.vlgmr.msra.gmra.mxu1 %vm189_vm3, %v238_v39 }
 0x3e7   :  { %v1322_v16 = vpop.f32.mrf.mxu3 }
 0x3ef   :  { %v1324_v34 = vpop.f32.mrf.mxu3 }
 0x3fd   :  { %v1265_v36 = vpop.f32.mrf.mxu1 }
 0x3fe   :  { %v1283_v58 = vadd.f32 %v1282_v31, %v1265_v36 }
 0x400   :  { %v1287_v35 = vmax.f32 %v1283_v58, 0.0 }
 0x405   :  { %v1267_v37 = vpop.f32.mrf.mxu1 }
 0x406   :  { %v1285_v48 = vadd.f32 %v1284_v43, %v1267_v37 }
 0x408   :  { %v1288_v46 = vmax.f32 %v1285_v48, 0.0 }
 0x40a   :  { %v1323_v49 = vadd.f32 %v1322_v16, %v1288_v46 }
 0x40c   :  { %1327 = vst.msk [vmem:[#allocation2 + $0x8] sm:$0xff] %vm82_vm0, %v1323_v49 }
 0x40d   :  { %v1304_v23 = vpop.f32.mrf.mxu1 }
 0x40e   :  { %v1305_v8 = vadd.f32 %v1304_v23, %v1287_v35 }
 0x410   :  { %1326 = vst.msk [vmem:[#allocation2] sm:$0xff] %vm82_vm0, %v1305_v8 }
 0x411   :  { %1340 = dma.vmem_to_hbm [thread:$0]  %s1333_s12, 256, %s1335_s14, [#allocation3], %s1546_s15, %s1546_s15, %s1547_s16  }
 0x415   :  { %v1306_v52 = vpop.f32.mrf.mxu1 }
 0x416   :  { %1543 = dma.done.wait [#allocation3], 256  }
 0x417   :  { %1544 = vsyncadd [#allocation3], 4294967040 }
 0x418   :  { %1345 = vsyncpa [#allocation3], 1 }

</bundles_post_ra>
